<compile_context>
chip_gen: v7x
topology: tpu7x:2x2x1
jax: 0.10.0
libtpu: 0.0.40
codegen_flags: <defaults>
</compile_context>

<pallas_src>
from collections import namedtuple

import jax
import jax.numpy as jnp
from jax.experimental import pallas as pl
from jax.experimental.pallas import tpu as pltpu

Genotype = namedtuple("Genotype", "normal normal_concat reduce reduce_concat")

# Synthetic (but valid) genotype: 4 steps, 2 edges per step, concat last 4 states.
GENOTYPE = Genotype(
    normal=[
        ("skip_connect", 0), ("skip_connect", 1),
        ("avg_pool_3x3", 0), ("skip_connect", 1),
        ("max_pool_3x3", 1), ("skip_connect", 2),
        ("skip_connect", 2), ("avg_pool_3x3", 3),
    ],
    normal_concat=[2, 3, 4, 5],
    reduce=[
        ("max_pool_3x3", 0), ("max_pool_3x3", 1),
        ("skip_connect", 2), ("max_pool_3x3", 1),
        ("skip_connect", 2), ("skip_connect", 3),
        ("skip_connect", 3), ("skip_connect", 4),
    ],
    reduce_concat=[2, 3, 4, 5],
)


# ----------------------------------------------------------------------------
# pltpu.roll convention (expected: jnp.roll semantics, result[i] = x[i-shift]).
# Probed once under the TPU interpreter -> no device compile, no host sync.
# ----------------------------------------------------------------------------
def _roll_probe_kernel(x_ref, o_ref):
    o_ref[...] = pltpu.roll(x_ref[...], 1, axis=1)


_ROLL_LIKE_NUMPY = None


def _roll_like_numpy():
    global _ROLL_LIKE_NUMPY
    if _ROLL_LIKE_NUMPY is None:
        try:
            with pltpu.force_tpu_interpret_mode():
                x = jnp.arange(8 * 128, dtype=jnp.float32).reshape(8, 128)
                y = pl.pallas_call(
                    _roll_probe_kernel,
                    out_shape=jax.ShapeDtypeStruct((8, 128), jnp.float32),
                )(x)
                # np.roll convention: y[0, 1] == x[0, 0] == 0 ; flipped: == 2
                _ROLL_LIKE_NUMPY = bool(float(y[0, 1]) < 1.0)
        except Exception:
            # TODO(synk): pinned to the documented jnp.roll convention if the
            # interpreter probe is unavailable in this JAX build.
            _ROLL_LIKE_NUMPY = True
    return _ROLL_LIKE_NUMPY


# ----------------------------------------------------------------------------
# Device / VMEM helpers (best effort, safe fallbacks).
# ----------------------------------------------------------------------------
def _parallel_grid_units():
    """How many grid steps we want to keep for cross-core parallelism."""
    try:
        kind = jax.devices()[0].device_kind.lower().replace(" ", "")
    except Exception:
        return 2
    # Single-TensorCore-per-device chips: fewer, fatter grid steps win.
    if any(tag in kind for tag in ("v5lite", "v5e", "v6lite", "v6e")):
        return 1
    # v7x / megacore chips: keep >= 2 "parallel" steps so both TCs get work.
    return 2


def _vmem_capacity_bytes():
    try:
        return int(pltpu.get_tpu_info().vmem_capacity_bytes)
    except Exception:
        return 64 * 1024 * 1024  # conservative (v7x per-TC VMEM)


# ----------------------------------------------------------------------------
# State-storage plan: states 0/1 (preprocess outputs) and any produced state
# NOT in the concat live in a VMEM scratch; every concat state is written to
# its o_ref channel slice as soon as it is produced (concat fused into stores)
# and read back from there by later consumers.
# ----------------------------------------------------------------------------
def _plan_state_slots(steps, concat):
    concat_pos = {s: j for j, s in enumerate(concat)}
    slot = {0: ("s", 0), 1: ("s", 1)}
    scratch_rows = 2
    for k in range(2, 2 + steps):
        if k in concat_pos:
            slot[k] = ("o", concat_pos[k])
        else:
            slot[k] = ("s", scratch_rows)
            scratch_rows += 1
    return slot, scratch_rows


# ----------------------------------------------------------------------------
# Fused cell kernel. One grid step processes `batch_block` batch elements; all
# intermediates stay in VMEM (st_ref scratch + o_ref), never round-trip HBM.
# ----------------------------------------------------------------------------
def _make_cell_kernel(op_names, indices, slot, C, D, H, W, batch_block,
                      roll_like_numpy):
    M = D * H * W
    HW = H * W
    steps = len(op_names) // 2
    NEG = float("-inf")

    def kernel(s0_ref, s1_ref, w_ref, b_ref, o_ref, st_ref):

        def pool_aux():
            # Per-lane w/h/d coordinates of the flattened D*H*W volume.
            # Float floor-division with a +0.5 bias is exact for these integer
            # lane indices (M << 2^24).  Recomputed per pool -> short live range.
            lane = jax.lax.broadcasted_iota(jnp.int32, (1, M), 1).astype(jnp.float32)
            d_i = jnp.floor((lane + 0.5) / float(HW))
            rem = lane - d_i * float(HW)
            h_i = jnp.floor((rem + 0.5) / float(W))
            w_i = rem - h_i * float(W)
            # (coordinate, axis extent, lane stride) per pooling axis
            return ((w_i, W, 1), (h_i, H, W), (d_i, D, HW))

        def valid_masks(coord, lim, shape):
            # Boolean validity of the prev/next neighbor, built by comparing an
            # f32 sublane-broadcast coordinate so selects see equal shapes.
            c = jnp.broadcast_to(coord, shape)
            return c >= 0.5, c <= (lim - 1.5)

        # TODO(synk): for volumes with H*W % 128 == 0 the D/H-axis taps should be
        # aligned shifted loads from a plane-padded VMEM scratch instead of lane
        # rolls, to take pressure off the 2 XLU units.
        def prev_next(v, s):
            # prev[m] = v[m - s], next[m] = v[m + s]; wrapped lanes land on
            # boundary positions and are deselected by the validity masks.
            if roll_like_numpy:
                return pltpu.roll(v, s, axis=1), pltpu.roll(v, M - s, axis=1)
            return pltpu.roll(v, M - s, axis=1), pltpu.roll(v, s, axis=1)

        def max_pool(v):          # separable 3-tap max along W, H, D
            for coord, lim, s in pool_aux():
                mp, mn = valid_masks(coord, lim, v.shape)
                p, n = prev_next(v, s)
                v = jnp.maximum(v, jnp.maximum(jnp.where(mp, p, NEG),
                                               jnp.where(mn, n, NEG)))
            return v

        def avg_pool(v):          # separable 3-tap sum, exact inverse count
            cnt = jnp.ones((1, M), jnp.float32)
            for coord, lim, s in pool_aux():
                cnt = cnt * (1.0
                             + jnp.where(coord >= 0.5, 1.0, 0.0)
                             + jnp.where(coord <= (lim - 1.5), 1.0, 0.0))
                mp, mn = valid_masks(coord, lim, v.shape)
                p, n = prev_next(v, s)
                v = v + jnp.where(mp, p, 0.0) + jnp.where(mn, n, 0.0)
            return v * pl.reciprocal(cnt, approx=True)   # count_include_pad=False

        def apply_op(name, v):
            if name == "skip_connect":
                return v
            if name == "max_pool_3x3":
                return max_pool(v)
            if name == "avg_pool_3x3":
                return avg_pool(v)
            raise ValueError(name)

        for b in range(batch_block):
            # preprocess0/1 fused into ONE MXU matmul:
            #   block-diag([w0, w1]) @ [relu(s0); relu(s1)]  (bf16 in, f32 acc)
            #   + folded-BN shift.
            x = jnp.concatenate([jnp.maximum(s0_ref[b], 0.0),
                                 jnp.maximum(s1_ref[b], 0.0)], axis=0)
            pre = jnp.dot(w_ref[...], x.astype(jnp.bfloat16),
                          preferred_element_type=jnp.float32) + b_ref[...]
            st_ref[0:2 * C, :] = pre                      # states 0 and 1

            def read_state(k):
                kind, r = slot[k]
                if kind == "s":
                    return st_ref[r * C:(r + 1) * C, :]
                return o_ref[b, r * C:(r + 1) * C, :].astype(jnp.float32)

            def write_state(k, v):
                kind, r = slot[k]
                if kind == "s":
                    st_ref[r * C:(r + 1) * C, :] = v
                else:       # concat state -> eager lane-dense store to output
                    o_ref[b, r * C:(r + 1) * C, :] = v.astype(o_ref.dtype)

            for i in range(steps):
                h1 = apply_op(op_names[2 * i], read_state(indices[2 * i]))
                h2 = apply_op(op_names[2 * i + 1], read_state(indices[2 * i + 1]))
                # TODO(synk): drop_path is a training-only stochastic mask; it is
                # a no-op for drop_prob == 0.0 / eval mode.
                write_state(i + 2, h1 + h2)

    return kernel


# ----------------------------------------------------------------------------
# The Cell
# ----------------------------------------------------------------------------
class PallasCell:
    SUPPORTED_OPS = ("skip_connect", "avg_pool_3x3", "max_pool_3x3")

    def __init__(self, genotype, C_prev_prev, C_prev, C, reduction,
                 reduction_prev, key, out_dtype=jnp.float32):
        if reduction or reduction_prev:
            # TODO(synk): FactorizedReduce / stride-2 reduction cells not implemented.
            raise NotImplementedError("only normal cells are supported")
        op_names, indices = zip(*genotype.normal)
        concat = list(genotype.normal_concat)
        assert len(op_names) == len(indices)
        for name in op_names:
            # TODO(synk): sep_conv / dil_conv OPS are not needed by this genotype.
            assert name in self.SUPPORTED_OPS, name

        self.C = C
        self.C_prev_prev = C_prev_prev
        self.C_prev = C_prev
        self._steps = len(op_names) // 2
        self._op_names = op_names
        self._indices = indices
        self._concat = concat
        self.multiplier = len(concat)
        self.out_dtype = out_dtype    # bf16 is a valid choice on BW-bound v5e
        self._slot, self._scratch_rows = _plan_state_slots(self._steps, concat)

        k0, k1 = jax.random.split(key)
        self.w0, self.b0 = self._make_relu_conv_bn(k0, C_prev_prev, C)
        self.w1, self.b1 = self._make_relu_conv_bn(k1, C_prev, C)
        # Fused block-diagonal preprocess weight (bf16 for the MXU) + shift.
        w_cat = jnp.zeros((2 * C, C_prev_prev + C_prev), jnp.float32)
        w_cat = w_cat.at[:C, :C_prev_prev].set(self.w0)
        w_cat = w_cat.at[C:, C_prev_prev:].set(self.w1)
        self.w_block = w_cat.astype(jnp.bfloat16)                 # (2C, Cin0+Cin1)
        self.b_cat = jnp.concatenate([self.b0, self.b1], axis=0)  # (2C, 1)
        self._fwd_cache = {}

    @staticmethod
    def _make_relu_conv_bn(key, c_in, c_out, eps=1e-5):
        # Conv3d(c_in, c_out, 1, bias=False) weight with eval-mode BatchNorm3d
        # (default affine/running stats) folded in: scale into the weight rows,
        # shift kept as a (c_out, 1) bias.  The folded weight is quantized to
        # bf16 once; those bf16 values are the module's canonical parameters.
        w = jax.random.normal(key, (c_out, c_in), jnp.float32) / jnp.sqrt(float(c_in))
        gamma = jnp.ones((c_out,), jnp.float32)
        beta = jnp.zeros((c_out,), jnp.float32)
        running_mean = jnp.zeros((c_out,), jnp.float32)
        running_var = jnp.ones((c_out,), jnp.float32)
        scale = gamma / jnp.sqrt(running_var + eps)
        shift = beta - running_mean * scale
        w_folded = (w * scale[:, None]).astype(jnp.bfloat16).astype(jnp.float32)
        return w_folded, shift.reshape(c_out, 1)

    def _get_forward(self, N, D, H, W):
        cache_key = (N, D, H, W)
        if cache_key in self._fwd_cache:
            return self._fwd_cache[cache_key]

        M = D * H * W
        C, C0, C1 = self.C, self.C_prev_prev, self.C_prev
        out_ch = self.multiplier * C
        out_isz = jnp.dtype(self.out_dtype).itemsize
        scratch_rows = self._scratch_rows

        def est_bytes(nb):          # double-buffered blocks + scratch + margin
            in_b = nb * (C0 + C1) * M * 4
            out_b = nb * out_ch * M * out_isz
            w_b = 2 * C * (C0 + C1) * 2 + 2 * C * 4
            return 2 * (in_b + out_b + w_b) + scratch_rows * C * M * 4 + (2 << 20)

        budget = int(_vmem_capacity_bytes() * 0.8)

        # Batch blocking: 1 fat step on single-TC chips, >=2 "parallel" steps on
        # multi-core chips; always bounded by the VMEM budget.
        nb = max(1, N // _parallel_grid_units())
        while N % nb:
            nb -= 1
        while nb > 1 and est_bytes(nb) > budget:
            nb -= 1
            while N % nb:
                nb -= 1
        if est_bytes(1) > budget:
            # TODO(synk): tile the D axis (with +-1-plane halos for the 3-tap
            # pools) when a single-element block no longer fits VMEM (v7x at
            # realistic medical volume sizes).
            raise NotImplementedError("volume too large for a single-block cell kernel")
        vmem_limit = min(budget, max(32 << 20, est_bytes(nb) + (4 << 20)))

        kernel = _make_cell_kernel(self._op_names, self._indices, self._slot,
                                   C, D, H, W, nb, _roll_like_numpy())
        fwd = pl.pallas_call(
            kernel,
            out_shape=jax.ShapeDtypeStruct((N, out_ch, M), self.out_dtype),
            grid=(N // nb,),
            in_specs=[
                pl.BlockSpec((nb, C0, M), lambda n: (n, 0, 0)),
                pl.BlockSpec((nb, C1, M), lambda n: (n, 0, 0)),
                pl.BlockSpec((2 * C, C0 + C1), lambda n: (0, 0)),
                pl.BlockSpec((2 * C, 1), lambda n: (0, 0)),
            ],
            out_specs=pl.BlockSpec((nb, out_ch, M), lambda n: (n, 0, 0)),
            scratch_shapes=[pltpu.VMEM((scratch_rows * C, M), jnp.float32)],
            compiler_params=pltpu.CompilerParams(
                dimension_semantics=("parallel",),
                vmem_limit_bytes=int(vmem_limit)),
        )
        self._fwd_cache[cache_key] = fwd
        return fwd

    def __call__(self, s0, s1, drop_prob=0.0):
        # TODO(synk): drop_path (training-only stochastic mask) is a no-op here.
        N, _, D, H, W = s0.shape
        M = D * H * W
        fwd = self._get_forward(N, D, H, W)
        # NCDHW -> (N, C_in, D*H*W): pure reshape, no host transpose/pad/concat.
        s0f = s0.reshape(N, self.C_prev_prev, M).astype(jnp.float32)
        s1f = s1.reshape(N, self.C_prev, M).astype(jnp.float32)
        out = fwd(s0f, s1f, self.w_block, self.b_cat)
        return out.reshape(N, self.multiplier * self.C, D, H, W)     # NCDHW


# ----------------------------------------------------------------------------
# Pure-JAX reference (mirrors the PyTorch Cell.forward in eval mode).
# ----------------------------------------------------------------------------
def reference_cell(cell, s0, s1):
    def pre(x, w, b):
        x = jnp.maximum(x, 0.0)
        y = jnp.einsum("oc,ncdhw->nodhw", w, x,
                       precision=jax.lax.Precision.HIGHEST)
        return y + b.reshape(1, -1, 1, 1, 1)

    def pool(x, kind):
        n_, c_, d_, h_, w_ = x.shape
        pad = ((0, 0), (0, 0), (1, 1), (1, 1), (1, 1))
        if kind == "max":
            xp = jnp.pad(x, pad, constant_values=-jnp.inf)
            acc = jnp.full(x.shape, -jnp.inf, x.dtype)
            for a in range(3):
                for b in range(3):
                    for c in range(3):
                        acc = jnp.maximum(acc, xp[:, :, a:a + d_, b:b + h_, c:c + w_])
            return acc
        xp = jnp.pad(x, pad)
        ones = jnp.pad(jnp.ones((1, 1, d_, h_, w_), x.dtype), pad)
        ssum = jnp.zeros_like(x)
        cnt = jnp.zeros((1, 1, d_, h_, w_), x.dtype)
        for a in range(3):
            for b in range(3):
                for c in range(3):
                    ssum = ssum + xp[:, :, a:a + d_, b:b + h_, c:c + w_]
                    cnt = cnt + ones[:, :, a:a + d_, b:b + h_, c:c + w_]
        return ssum / cnt          # AvgPool3d(count_include_pad=False)

    def apply_op(name, x):
        if name == "skip_connect":
            return x
        if name == "avg_pool_3x3":
            return pool(x, "avg")
        return pool(x, "max")

    states = [pre(s0, cell.w0, cell.b0), pre(s1, cell.w1, cell.b1)]
    for i in range(cell._steps):
        h1 = apply_op(cell._op_names[2 * i], states[cell._indices[2 * i]])
        h2 = apply_op(cell._op_names[2 * i + 1], states[cell._indices[2 * i + 1]])
        states.append(h1 + h2)
    return jnp.concatenate([states[i] for i in cell._concat], axis=1)


if __name__ == "__main__":
    key = jax.random.PRNGKey(0)
    kp, kx0, kx1 = jax.random.split(key, 3)

    N = 2
    C_prev_prev, C_prev, C = 8, 8, 16
    D = H = W = 8

    cell = PallasCell(GENOTYPE, C_prev_prev, C_prev, C,
                      reduction=False, reduction_prev=False, key=kp)

    s0 = jax.random.normal(kx0, (N, C_prev_prev, D, H, W), jnp.float32)
    s1 = jax.random.normal(kx1, (N, C_prev, D, H, W), jnp.float32)

    out = jax.block_until_ready(cell(s0, s1, drop_prob=0.0))

    expected_shape = (N, cell.multiplier * C, D, H, W)
    assert out.shape == expected_shape, (out.shape, expected_shape)
    assert bool(jnp.all(jnp.isfinite(out)))

    ref = jax.block_until_ready(reference_cell(cell, s0, s1))
    max_err = float(jnp.max(jnp.abs(out.astype(jnp.float32) - ref)))
    # Only bf16 activation rounding in the fused matmul and the approx
    # reciprocal of the (integer) pooling counts separate kernel from reference.
    assert max_err < 0.2, f"kernel deviates from reference: max_err={max_err}"

    print("KERNEL_OK")
</pallas_src>

<mosaic_0001>
module attributes {stable_mosaic.version = 11 : i64} {
  func.func @kernel(%arg0: i32, %arg1: memref<1x8x512xf32, #tpu.memory_space<vmem>>, %arg2: memref<1x8x512xf32, #tpu.memory_space<vmem>>, %arg3: memref<32x16xbf16, #tpu.memory_space<vmem>>, %arg4: memref<32x1xf32, #tpu.memory_space<vmem>>, %arg5: memref<1x64x512xf32, #tpu.memory_space<vmem>>, %arg6: memref<32x512xf32, #tpu.memory_space<vmem>>) attributes {dimension_semantics = [#tpu.dimension_semantics<parallel>], iteration_bounds = array<i64: 2>, scalar_prefetch = 0 : i64, scratch_operands = 1 : i64, tpu.core_type = #tpu.core_type<tc>, window_params = [{transform_indices = @transform_0, window_bounds = array<i64: 1, 8, 512>}, {transform_indices = @transform_1, window_bounds = array<i64: 1, 8, 512>}, {pipeline_mode = #tpu.pipeline_mode<synchronous>, transform_indices = @transform_2, window_bounds = array<i64: 32, 16>}, {pipeline_mode = #tpu.pipeline_mode<synchronous>, transform_indices = @transform_3, window_bounds = array<i64: 32, 1>}, {transform_indices = @transform_4, window_bounds = array<i64: 1, 64, 512>}]} {
    %c0 = arith.constant 0 : index
    %c0_0 = arith.constant 0 : index
    %c0_1 = arith.constant 0 : index
    %0 = vector.load %arg1[%c0, %c0_0, %c0_1] : memref<1x8x512xf32, #tpu.memory_space<vmem>>, vector<1x8x512xf32>
    %1 = vector.shape_cast %0 : vector<1x8x512xf32> to vector<8x512xf32>
    %cst = arith.constant 0.000000e+00 : f32
    %2 = vector.broadcast %cst : f32 to vector<8x512xf32>
    %3 = arith.maximumf %1, %2 : vector<8x512xf32>
    %c0_2 = arith.constant 0 : index
    %c0_3 = arith.constant 0 : index
    %c0_4 = arith.constant 0 : index
    %4 = vector.load %arg2[%c0_2, %c0_3, %c0_4] : memref<1x8x512xf32, #tpu.memory_space<vmem>>, vector<1x8x512xf32>
    %5 = vector.shape_cast %4 : vector<1x8x512xf32> to vector<8x512xf32>
    %cst_5 = arith.constant 0.000000e+00 : f32
    %6 = vector.broadcast %cst_5 : f32 to vector<8x512xf32>
    %7 = arith.maximumf %5, %6 : vector<8x512xf32>
    %8 = tpu.concatenate %3, %7 in 0 : vector<8x512xf32>, vector<8x512xf32> -> vector<16x512xf32>
    %c0_6 = arith.constant 0 : index
    %c0_7 = arith.constant 0 : index
    %9 = vector.load %arg3[%c0_6, %c0_7] : memref<32x16xbf16, #tpu.memory_space<vmem>>, vector<32x16xbf16>
    %10 = arith.truncf %8 : vector<16x512xf32> to vector<16x512xbf16>
    %cst_8 = arith.constant dense<0.000000e+00> : vector<32x512xf32>
    %11 = tpu.matmul %9, %10, %cst_8 {dimension_numbers = #tpu.dot_dimension_numbers<[1], [0], [0], [1], [0, 0, 1, 1], [], []>} : vector<32x16xbf16>, vector<16x512xbf16>, vector<32x512xf32> -> vector<32x512xf32>
    %c0_9 = arith.constant 0 : index
    %c0_10 = arith.constant 0 : index
    %12 = vector.load %arg4[%c0_9, %c0_10] : memref<32x1xf32, #tpu.memory_space<vmem>>, vector<32x1xf32>
    %13 = vector.broadcast %12 : vector<32x1xf32> to vector<32x512xf32>
    %14 = arith.addf %11, %13 : vector<32x512xf32>
    %c0_11 = arith.constant 0 : index
    %c0_12 = arith.constant 0 : index
    %15 = vector.load %arg6[%c0_11, %c0_12] : memref<32x512xf32, #tpu.memory_space<vmem>>, vector<32x512xf32>
    tpu.vector_store %arg6[%c0_11, %c0_12], %14 {strides = array<i32>} : memref<32x512xf32, #tpu.memory_space<vmem>>, vector<32x512xf32>,
    %c0_13 = arith.constant 0 : index
    %c0_14 = arith.constant 0 : index
    %16 = vector.load %arg6[%c0_13, %c0_14] : memref<32x512xf32, #tpu.memory_space<vmem>>, vector<16x512xf32>
    %c16 = arith.constant 16 : index
    %c0_15 = arith.constant 0 : index
    %17 = vector.load %arg6[%c16, %c0_15] : memref<32x512xf32, #tpu.memory_space<vmem>>, vector<16x512xf32>
    %18 = arith.addf %16, %17 : vector<16x512xf32>
    %c0_16 = arith.constant 0 : index
    %c0_17 = arith.constant 0 : index
    %c0_18 = arith.constant 0 : index
    %19 = vector.load %arg5[%c0_16, %c0_17, %c0_18] : memref<1x64x512xf32, #tpu.memory_space<vmem>>, vector<1x16x512xf32>
    %20 = vector.shape_cast %19 : vector<1x16x512xf32> to vector<16x512xf32>
    %21 = vector.shape_cast %18 : vector<16x512xf32> to vector<1x16x512xf32>
    tpu.vector_store %arg5[%c0_16, %c0_17, %c0_18], %21 {strides = array<i32>} : memref<1x64x512xf32, #tpu.memory_space<vmem>>, vector<1x16x512xf32>,
    %c0_19 = arith.constant 0 : index
    %c0_20 = arith.constant 0 : index
    %22 = vector.load %arg6[%c0_19, %c0_20] : memref<32x512xf32, #tpu.memory_space<vmem>>, vector<16x512xf32>
    %cst_21 = arith.constant 1.000000e+00 : f32
    %23 = vector.broadcast %cst_21 : f32 to vector<1x512xf32>
    %24 = tpu.iota {dimensions = array<i32: 1>} : vector<1x512xi32>
    %25 = arith.sitofp %24 : vector<1x512xi32> to vector<1x512xf32>
    %cst_22 = arith.constant 5.000000e-01 : f32
    %26 = vector.broadcast %cst_22 : f32 to vector<1x512xf32>
    %27 = arith.addf %25, %26 : vector<1x512xf32>
    %cst_23 = arith.constant 6.400000e+01 : f32
    %28 = vector.broadcast %cst_23 : f32 to vector<1x512xf32>
    %29 = arith.divf %27, %28 : vector<1x512xf32>
    %30 = math.floor %29 : vector<1x512xf32>
    %cst_24 = arith.constant 6.400000e+01 : f32
    %31 = vector.broadcast %cst_24 : f32 to vector<1x512xf32>
    %32 = arith.mulf %30, %31 : vector<1x512xf32>
    %33 = arith.subf %25, %32 : vector<1x512xf32>
    %cst_25 = arith.constant 5.000000e-01 : f32
    %34 = vector.broadcast %cst_25 : f32 to vector<1x512xf32>
    %35 = arith.addf %33, %34 : vector<1x512xf32>
    %cst_26 = arith.constant 8.000000e+00 : f32
    %36 = vector.broadcast %cst_26 : f32 to vector<1x512xf32>
    %37 = arith.divf %35, %36 : vector<1x512xf32>
    %38 = math.floor %37 : vector<1x512xf32>
    %cst_27 = arith.constant 8.000000e+00 : f32
    %39 = vector.broadcast %cst_27 : f32 to vector<1x512xf32>
    %40 = arith.mulf %38, %39 : vector<1x512xf32>
    %41 = arith.subf %33, %40 : vector<1x512xf32>
    %cst_28 = arith.constant 5.000000e-01 : f32
    %42 = vector.broadcast %cst_28 : f32 to vector<1x512xf32>
    %43 = arith.cmpf oge, %41, %42 : vector<1x512xf32>
    %cst_29 = arith.constant 1.000000e+00 : f32
    %cst_30 = arith.constant 0.000000e+00 : f32
    %44 = vector.broadcast %cst_29 : f32 to vector<1x512xf32>
    %45 = vector.broadcast %cst_30 : f32 to vector<1x512xf32>
    %46 = arith.select %43, %44, %45 : vector<1x512xi1>, vector<1x512xf32>
    %cst_31 = arith.constant 1.000000e+00 : f32
    %47 = vector.broadcast %cst_31 : f32 to vector<1x512xf32>
    %48 = arith.addf %47, %46 : vector<1x512xf32>
    %cst_32 = arith.constant 6.500000e+00 : f32
    %49 = vector.broadcast %cst_32 : f32 to vector<1x512xf32>
    %50 = arith.cmpf ole, %41, %49 : vector<1x512xf32>
    %cst_33 = arith.constant 1.000000e+00 : f32
    %cst_34 = arith.constant 0.000000e+00 : f32
    %51 = vector.broadcast %cst_33 : f32 to vector<1x512xf32>
    %52 = vector.broadcast %cst_34 : f32 to vector<1x512xf32>
    %53 = arith.select %50, %51, %52 : vector<1x512xi1>, vector<1x512xf32>
    %54 = arith.addf %48, %53 : vector<1x512xf32>
    %55 = arith.mulf %23, %54 : vector<1x512xf32>
    %56 = vector.shape_cast %41 : vector<1x512xf32> to vector<1x512xf32>
    %57 = vector.broadcast %56 : vector<1x512xf32> to vector<16x512xf32>
    %cst_35 = arith.constant 5.000000e-01 : f32
    %58 = vector.broadcast %cst_35 : f32 to vector<16x512xf32>
    %59 = arith.cmpf oge, %57, %58 : vector<16x512xf32>
    %cst_36 = arith.constant 6.500000e+00 : f32
    %60 = vector.broadcast %cst_36 : f32 to vector<16x512xf32>
    %61 = arith.cmpf ole, %57, %60 : vector<16x512xf32>
    %c1_i32 = arith.constant 1 : i32
    %62 = tpu.dynamic_rotate %22 by %c1_i32 dim 1 : vector<16x512xf32>, i32 -> vector<16x512xf32>
    %c511_i32 = arith.constant 511 : i32
    %63 = tpu.dynamic_rotate %22 by %c511_i32 dim 1 : vector<16x512xf32>, i32 -> vector<16x512xf32>
    %cst_37 = arith.constant 0.000000e+00 : f32
    %64 = vector.broadcast %cst_37 : f32 to vector<16x512xf32>
    %65 = arith.select %59, %62, %64 : vector<16x512xi1>, vector<16x512xf32>
    %66 = arith.addf %22, %65 : vector<16x512xf32>
    %cst_38 = arith.constant 0.000000e+00 : f32
    %67 = vector.broadcast %cst_38 : f32 to vector<16x512xf32>
    %68 = arith.select %61, %63, %67 : vector<16x512xi1>, vector<16x512xf32>
    %69 = arith.addf %66, %68 : vector<16x512xf32>
    %cst_39 = arith.constant 5.000000e-01 : f32
    %70 = vector.broadcast %cst_39 : f32 to vector<1x512xf32>
    %71 = arith.cmpf oge, %38, %70 : vector<1x512xf32>
    %cst_40 = arith.constant 1.000000e+00 : f32
    %cst_41 = arith.constant 0.000000e+00 : f32
    %72 = vector.broadcast %cst_40 : f32 to vector<1x512xf32>
    %73 = vector.broadcast %cst_41 : f32 to vector<1x512xf32>
    %74 = arith.select %71, %72, %73 : vector<1x512xi1>, vector<1x512xf32>
    %cst_42 = arith.constant 1.000000e+00 : f32
    %75 = vector.broadcast %cst_42 : f32 to vector<1x512xf32>
    %76 = arith.addf %75, %74 : vector<1x512xf32>
    %cst_43 = arith.constant 6.500000e+00 : f32
    %77 = vector.broadcast %cst_43 : f32 to vector<1x512xf32>
    %78 = arith.cmpf ole, %38, %77 : vector<1x512xf32>
    %cst_44 = arith.constant 1.000000e+00 : f32
    %cst_45 = arith.constant 0.000000e+00 : f32
    %79 = vector.broadcast %cst_44 : f32 to vector<1x512xf32>
    %80 = vector.broadcast %cst_45 : f32 to vector<1x512xf32>
    %81 = arith.select %78, %79, %80 : vector<1x512xi1>, vector<1x512xf32>
    %82 = arith.addf %76, %81 : vector<1x512xf32>
    %83 = arith.mulf %55, %82 : vector<1x512xf32>
    %84 = vector.shape_cast %38 : vector<1x512xf32> to vector<1x512xf32>
    %85 = vector.broadcast %84 : vector<1x512xf32> to vector<16x512xf32>
    %cst_46 = arith.constant 5.000000e-01 : f32
    %86 = vector.broadcast %cst_46 : f32 to vector<16x512xf32>
    %87 = arith.cmpf oge, %85, %86 : vector<16x512xf32>
    %cst_47 = arith.constant 6.500000e+00 : f32
    %88 = vector.broadcast %cst_47 : f32 to vector<16x512xf32>
    %89 = arith.cmpf ole, %85, %88 : vector<16x512xf32>
    %c8_i32 = arith.constant 8 : i32
    %90 = tpu.dynamic_rotate %69 by %c8_i32 dim 1 : vector<16x512xf32>, i32 -> vector<16x512xf32>
    %c504_i32 = arith.constant 504 : i32
    %91 = tpu.dynamic_rotate %69 by %c504_i32 dim 1 : vector<16x512xf32>, i32 -> vector<16x512xf32>
    %cst_48 = arith.constant 0.000000e+00 : f32
    %92 = vector.broadcast %cst_48 : f32 to vector<16x512xf32>
    %93 = arith.select %87, %90, %92 : vector<16x512xi1>, vector<16x512xf32>
    %94 = arith.addf %69, %93 : vector<16x512xf32>
    %cst_49 = arith.constant 0.000000e+00 : f32
    %95 = vector.broadcast %cst_49 : f32 to vector<16x512xf32>
    %96 = arith.select %89, %91, %95 : vector<16x512xi1>, vector<16x512xf32>
    %97 = arith.addf %94, %96 : vector<16x512xf32>
    %cst_50 = arith.constant 5.000000e-01 : f32
    %98 = vector.broadcast %cst_50 : f32 to vector<1x512xf32>
    %99 = arith.cmpf oge, %30, %98 : vector<1x512xf32>
    %cst_51 = arith.constant 1.000000e+00 : f32
    %cst_52 = arith.constant 0.000000e+00 : f32
    %100 = vector.broadcast %cst_51 : f32 to vector<1x512xf32>
    %101 = vector.broadcast %cst_52 : f32 to vector<1x512xf32>
    %102 = arith.select %99, %100, %101 : vector<1x512xi1>, vector<1x512xf32>
    %cst_53 = arith.constant 1.000000e+00 : f32
    %103 = vector.broadcast %cst_53 : f32 to vector<1x512xf32>
    %104 = arith.addf %103, %102 : vector<1x512xf32>
    %cst_54 = arith.constant 6.500000e+00 : f32
    %105 = vector.broadcast %cst_54 : f32 to vector<1x512xf32>
    %106 = arith.cmpf ole, %30, %105 : vector<1x512xf32>
    %cst_55 = arith.constant 1.000000e+00 : f32
    %cst_56 = arith.constant 0.000000e+00 : f32
    %107 = vector.broadcast %cst_55 : f32 to vector<1x512xf32>
    %108 = vector.broadcast %cst_56 : f32 to vector<1x512xf32>
    %109 = arith.select %106, %107, %108 : vector<1x512xi1>, vector<1x512xf32>
    %110 = arith.addf %104, %109 : vector<1x512xf32>
    %111 = arith.mulf %83, %110 : vector<1x512xf32>
    %112 = vector.shape_cast %30 : vector<1x512xf32> to vector<1x512xf32>
    %113 = vector.broadcast %112 : vector<1x512xf32> to vector<16x512xf32>
    %cst_57 = arith.constant 5.000000e-01 : f32
    %114 = vector.broadcast %cst_57 : f32 to vector<16x512xf32>
    %115 = arith.cmpf oge, %113, %114 : vector<16x512xf32>
    %cst_58 = arith.constant 6.500000e+00 : f32
    %116 = vector.broadcast %cst_58 : f32 to vector<16x512xf32>
    %117 = arith.cmpf ole, %113, %116 : vector<16x512xf32>
    %c64_i32 = arith.constant 64 : i32
    %118 = tpu.dynamic_rotate %97 by %c64_i32 dim 1 : vector<16x512xf32>, i32 -> vector<16x512xf32>
    %c448_i32 = arith.constant 448 : i32
    %119 = tpu.dynamic_rotate %97 by %c448_i32 dim 1 : vector<16x512xf32>, i32 -> vector<16x512xf32>
    %cst_59 = arith.constant 0.000000e+00 : f32
    %120 = vector.broadcast %cst_59 : f32 to vector<16x512xf32>
    %121 = arith.select %115, %118, %120 : vector<16x512xi1>, vector<16x512xf32>
    %122 = arith.addf %97, %121 : vector<16x512xf32>
    %cst_60 = arith.constant 0.000000e+00 : f32
    %123 = vector.broadcast %cst_60 : f32 to vector<16x512xf32>
    %124 = arith.select %117, %119, %123 : vector<16x512xi1>, vector<16x512xf32>
    %125 = arith.addf %122, %124 : vector<16x512xf32>
    %126 = tpu.reciprocal %111 {approx = true} : vector<1x512xf32> -> vector<1x512xf32>
    %127 = vector.broadcast %126 : vector<1x512xf32> to vector<16x512xf32>
    %128 = arith.mulf %125, %127 : vector<16x512xf32>
    %c16_61 = arith.constant 16 : index
    %c0_62 = arith.constant 0 : index
    %129 = vector.load %arg6[%c16_61, %c0_62] : memref<32x512xf32, #tpu.memory_space<vmem>>, vector<16x512xf32>
    %130 = arith.addf %128, %129 : vector<16x512xf32>
    %c0_63 = arith.constant 0 : index
    %c16_64 = arith.constant 16 : index
    %c0_65 = arith.constant 0 : index
    %131 = vector.load %arg5[%c0_63, %c16_64, %c0_65] : memref<1x64x512xf32, #tpu.memory_space<vmem>>, vector<1x16x512xf32>
    %132 = vector.shape_cast %131 : vector<1x16x512xf32> to vector<16x512xf32>
    %133 = vector.shape_cast %130 : vector<16x512xf32> to vector<1x16x512xf32>
    tpu.vector_store %arg5[%c0_63, %c16_64, %c0_65], %133 {strides = array<i32>} : memref<1x64x512xf32, #tpu.memory_space<vmem>>, vector<1x16x512xf32>,
    %c16_66 = arith.constant 16 : index
    %c0_67 = arith.constant 0 : index
    %134 = vector.load %arg6[%c16_66, %c0_67] : memref<32x512xf32, #tpu.memory_space<vmem>>, vector<16x512xf32>
    %135 = tpu.iota {dimensions = array<i32: 1>} : vector<1x512xi32>
    %136 = arith.sitofp %135 : vector<1x512xi32> to vector<1x512xf32>
    %cst_68 = arith.constant 5.000000e-01 : f32
    %137 = vector.broadcast %cst_68 : f32 to vector<1x512xf32>
    %138 = arith.addf %136, %137 : vector<1x512xf32>
    %cst_69 = arith.constant 6.400000e+01 : f32
    %139 = vector.broadcast %cst_69 : f32 to vector<1x512xf32>
    %140 = arith.divf %138, %139 : vector<1x512xf32>
    %141 = math.floor %140 : vector<1x512xf32>
    %cst_70 = arith.constant 6.400000e+01 : f32
    %142 = vector.broadcast %cst_70 : f32 to vector<1x512xf32>
    %143 = arith.mulf %141, %142 : vector<1x512xf32>
    %144 = arith.subf %136, %143 : vector<1x512xf32>
    %cst_71 = arith.constant 5.000000e-01 : f32
    %145 = vector.broadcast %cst_71 : f32 to vector<1x512xf32>
    %146 = arith.addf %144, %145 : vector<1x512xf32>
    %cst_72 = arith.constant 8.000000e+00 : f32
    %147 = vector.broadcast %cst_72 : f32 to vector<1x512xf32>
    %148 = arith.divf %146, %147 : vector<1x512xf32>
    %149 = math.floor %148 : vector<1x512xf32>
    %cst_73 = arith.constant 8.000000e+00 : f32
    %150 = vector.broadcast %cst_73 : f32 to vector<1x512xf32>
    %151 = arith.mulf %149, %150 : vector<1x512xf32>
    %152 = arith.subf %144, %151 : vector<1x512xf32>
    %153 = vector.shape_cast %152 : vector<1x512xf32> to vector<1x512xf32>
    %154 = vector.broadcast %153 : vector<1x512xf32> to vector<16x512xf32>
    %cst_74 = arith.constant 5.000000e-01 : f32
    %155 = vector.broadcast %cst_74 : f32 to vector<16x512xf32>
    %156 = arith.cmpf oge, %154, %155 : vector<16x512xf32>
    %cst_75 = arith.constant 6.500000e+00 : f32
    %157 = vector.broadcast %cst_75 : f32 to vector<16x512xf32>
    %158 = arith.cmpf ole, %154, %157 : vector<16x512xf32>
    %c1_i32_76 = arith.constant 1 : i32
    %159 = tpu.dynamic_rotate %134 by %c1_i32_76 dim 1 : vector<16x512xf32>, i32 -> vector<16x512xf32>
    %c511_i32_77 = arith.constant 511 : i32
    %160 = tpu.dynamic_rotate %134 by %c511_i32_77 dim 1 : vector<16x512xf32>, i32 -> vector<16x512xf32>
    %cst_78 = arith.constant 0xFF800000 : f32
    %161 = vector.broadcast %cst_78 : f32 to vector<16x512xf32>
    %162 = arith.select %156, %159, %161 : vector<16x512xi1>, vector<16x512xf32>
    %cst_79 = arith.constant 0xFF800000 : f32
    %163 = vector.broadcast %cst_79 : f32 to vector<16x512xf32>
    %164 = arith.select %158, %160, %163 : vector<16x512xi1>, vector<16x512xf32>
    %165 = arith.maximumf %162, %164 : vector<16x512xf32>
    %166 = arith.maximumf %134, %165 : vector<16x512xf32>
    %167 = vector.shape_cast %149 : vector<1x512xf32> to vector<1x512xf32>
    %168 = vector.broadcast %167 : vector<1x512xf32> to vector<16x512xf32>
    %cst_80 = arith.constant 5.000000e-01 : f32
    %169 = vector.broadcast %cst_80 : f32 to vector<16x512xf32>
    %170 = arith.cmpf oge, %168, %169 : vector<16x512xf32>
    %cst_81 = arith.constant 6.500000e+00 : f32
    %171 = vector.broadcast %cst_81 : f32 to vector<16x512xf32>
    %172 = arith.cmpf ole, %168, %171 : vector<16x512xf32>
    %c8_i32_82 = arith.constant 8 : i32
    %173 = tpu.dynamic_rotate %166 by %c8_i32_82 dim 1 : vector<16x512xf32>, i32 -> vector<16x512xf32>
    %c504_i32_83 = arith.constant 504 : i32
    %174 = tpu.dynamic_rotate %166 by %c504_i32_83 dim 1 : vector<16x512xf32>, i32 -> vector<16x512xf32>
    %cst_84 = arith.constant 0xFF800000 : f32
    %175 = vector.broadcast %cst_84 : f32 to vector<16x512xf32>
    %176 = arith.select %170, %173, %175 : vector<16x512xi1>, vector<16x512xf32>
    %cst_85 = arith.constant 0xFF800000 : f32
    %177 = vector.broadcast %cst_85 : f32 to vector<16x512xf32>
    %178 = arith.select %172, %174, %177 : vector<16x512xi1>, vector<16x512xf32>
    %179 = arith.maximumf %176, %178 : vector<16x512xf32>
    %180 = arith.maximumf %166, %179 : vector<16x512xf32>
    %181 = vector.shape_cast %141 : vector<1x512xf32> to vector<1x512xf32>
    %182 = vector.broadcast %181 : vector<1x512xf32> to vector<16x512xf32>
    %cst_86 = arith.constant 5.000000e-01 : f32
    %183 = vector.broadcast %cst_86 : f32 to vector<16x512xf32>
    %184 = arith.cmpf oge, %182, %183 : vector<16x512xf32>
    %cst_87 = arith.constant 6.500000e+00 : f32
    %185 = vector.broadcast %cst_87 : f32 to vector<16x512xf32>
    %186 = arith.cmpf ole, %182, %185 : vector<16x512xf32>
    %c64_i32_88 = arith.constant 64 : i32
    %187 = tpu.dynamic_rotate %180 by %c64_i32_88 dim 1 : vector<16x512xf32>, i32 -> vector<16x512xf32>
    %c448_i32_89 = arith.constant 448 : i32
    %188 = tpu.dynamic_rotate %180 by %c448_i32_89 dim 1 : vector<16x512xf32>, i32 -> vector<16x512xf32>
    %cst_90 = arith.constant 0xFF800000 : f32
    %189 = vector.broadcast %cst_90 : f32 to vector<16x512xf32>
    %190 = arith.select %184, %187, %189 : vector<16x512xi1>, vector<16x512xf32>
    %cst_91 = arith.constant 0xFF800000 : f32
    %191 = vector.broadcast %cst_91 : f32 to vector<16x512xf32>
    %192 = arith.select %186, %188, %191 : vector<16x512xi1>, vector<16x512xf32>
    %193 = arith.maximumf %190, %192 : vector<16x512xf32>
    %194 = arith.maximumf %180, %193 : vector<16x512xf32>
    %c0_92 = arith.constant 0 : index
    %c0_93 = arith.constant 0 : index
    %c0_94 = arith.constant 0 : index
    %195 = vector.load %arg5[%c0_92, %c0_93, %c0_94] : memref<1x64x512xf32, #tpu.memory_space<vmem>>, vector<1x16x512xf32>
    %196 = vector.shape_cast %195 : vector<1x16x512xf32> to vector<16x512xf32>
    %197 = arith.addf %194, %196 : vector<16x512xf32>
    %c0_95 = arith.constant 0 : index
    %c32 = arith.constant 32 : index
    %c0_96 = arith.constant 0 : index
    %198 = vector.load %arg5[%c0_95, %c32, %c0_96] : memref<1x64x512xf32, #tpu.memory_space<vmem>>, vector<1x16x512xf32>
    %199 = vector.shape_cast %198 : vector<1x16x512xf32> to vector<16x512xf32>
    %200 = vector.shape_cast %197 : vector<16x512xf32> to vector<1x16x512xf32>
    tpu.vector_store %arg5[%c0_95, %c32, %c0_96], %200 {strides = array<i32>} : memref<1x64x512xf32, #tpu.memory_space<vmem>>, vector<1x16x512xf32>,
    %c0_97 = arith.constant 0 : index
    %c0_98 = arith.constant 0 : index
    %c0_99 = arith.constant 0 : index
    %201 = vector.load %arg5[%c0_97, %c0_98, %c0_99] : memref<1x64x512xf32, #tpu.memory_space<vmem>>, vector<1x16x512xf32>
    %202 = vector.shape_cast %201 : vector<1x16x512xf32> to vector<16x512xf32>
    %c0_100 = arith.constant 0 : index
    %c16_101 = arith.constant 16 : index
    %c0_102 = arith.constant 0 : index
    %203 = vector.load %arg5[%c0_100, %c16_101, %c0_102] : memref<1x64x512xf32, #tpu.memory_space<vmem>>, vector<1x16x512xf32>
    %204 = vector.shape_cast %203 : vector<1x16x512xf32> to vector<16x512xf32>
    %cst_103 = arith.constant 1.000000e+00 : f32
    %205 = vector.broadcast %cst_103 : f32 to vector<1x512xf32>
    %206 = tpu.iota {dimensions = array<i32: 1>} : vector<1x512xi32>
    %207 = arith.sitofp %206 : vector<1x512xi32> to vector<1x512xf32>
    %cst_104 = arith.constant 5.000000e-01 : f32
    %208 = vector.broadcast %cst_104 : f32 to vector<1x512xf32>
    %209 = arith.addf %207, %208 : vector<1x512xf32>
    %cst_105 = arith.constant 6.400000e+01 : f32
    %210 = vector.broadcast %cst_105 : f32 to vector<1x512xf32>
    %211 = arith.divf %209, %210 : vector<1x512xf32>
    %212 = math.floor %211 : vector<1x512xf32>
    %cst_106 = arith.constant 6.400000e+01 : f32
    %213 = vector.broadcast %cst_106 : f32 to vector<1x512xf32>
    %214 = arith.mulf %212, %213 : vector<1x512xf32>
    %215 = arith.subf %207, %214 : vector<1x512xf32>
    %cst_107 = arith.constant 5.000000e-01 : f32
    %216 = vector.broadcast %cst_107 : f32 to vector<1x512xf32>
    %217 = arith.addf %215, %216 : vector<1x512xf32>
    %cst_108 = arith.constant 8.000000e+00 : f32
    %218 = vector.broadcast %cst_108 : f32 to vector<1x512xf32>
    %219 = arith.divf %217, %218 : vector<1x512xf32>
    %220 = math.floor %219 : vector<1x512xf32>
    %cst_109 = arith.constant 8.000000e+00 : f32
    %221 = vector.broadcast %cst_109 : f32 to vector<1x512xf32>
    %222 = arith.mulf %220, %221 : vector<1x512xf32>
    %223 = arith.subf %215, %222 : vector<1x512xf32>
    %cst_110 = arith.constant 5.000000e-01 : f32
    %224 = vector.broadcast %cst_110 : f32 to vector<1x512xf32>
    %225 = arith.cmpf oge, %223, %224 : vector<1x512xf32>
    %cst_111 = arith.constant 1.000000e+00 : f32
    %cst_112 = arith.constant 0.000000e+00 : f32
    %226 = vector.broadcast %cst_111 : f32 to vector<1x512xf32>
    %227 = vector.broadcast %cst_112 : f32 to vector<1x512xf32>
    %228 = arith.select %225, %226, %227 : vector<1x512xi1>, vector<1x512xf32>
    %cst_113 = arith.constant 1.000000e+00 : f32
    %229 = vector.broadcast %cst_113 : f32 to vector<1x512xf32>
    %230 = arith.addf %229, %228 : vector<1x512xf32>
    %cst_114 = arith.constant 6.500000e+00 : f32
    %231 = vector.broadcast %cst_114 : f32 to vector<1x512xf32>
    %232 = arith.cmpf ole, %223, %231 : vector<1x512xf32>
    %cst_115 = arith.constant 1.000000e+00 : f32
    %cst_116 = arith.constant 0.000000e+00 : f32
    %233 = vector.broadcast %cst_115 : f32 to vector<1x512xf32>
    %234 = vector.broadcast %cst_116 : f32 to vector<1x512xf32>
    %235 = arith.select %232, %233, %234 : vector<1x512xi1>, vector<1x512xf32>
    %236 = arith.addf %230, %235 : vector<1x512xf32>
    %237 = arith.mulf %205, %236 : vector<1x512xf32>
    %238 = vector.shape_cast %223 : vector<1x512xf32> to vector<1x512xf32>
    %239 = vector.broadcast %238 : vector<1x512xf32> to vector<16x512xf32>
    %cst_117 = arith.constant 5.000000e-01 : f32
    %240 = vector.broadcast %cst_117 : f32 to vector<16x512xf32>
    %241 = arith.cmpf oge, %239, %240 : vector<16x512xf32>
    %cst_118 = arith.constant 6.500000e+00 : f32
    %242 = vector.broadcast %cst_118 : f32 to vector<16x512xf32>
    %243 = arith.cmpf ole, %239, %242 : vector<16x512xf32>
    %c1_i32_119 = arith.constant 1 : i32
    %244 = tpu.dynamic_rotate %204 by %c1_i32_119 dim 1 : vector<16x512xf32>, i32 -> vector<16x512xf32>
    %c511_i32_120 = arith.constant 511 : i32
    %245 = tpu.dynamic_rotate %204 by %c511_i32_120 dim 1 : vector<16x512xf32>, i32 -> vector<16x512xf32>
    %cst_121 = arith.constant 0.000000e+00 : f32
    %246 = vector.broadcast %cst_121 : f32 to vector<16x512xf32>
    %247 = arith.select %241, %244, %246 : vector<16x512xi1>, vector<16x512xf32>
    %248 = arith.addf %204, %247 : vector<16x512xf32>
    %cst_122 = arith.constant 0.000000e+00 : f32
    %249 = vector.broadcast %cst_122 : f32 to vector<16x512xf32>
    %250 = arith.select %243, %245, %249 : vector<16x512xi1>, vector<16x512xf32>
    %251 = arith.addf %248, %250 : vector<16x512xf32>
    %cst_123 = arith.constant 5.000000e-01 : f32
    %252 = vector.broadcast %cst_123 : f32 to vector<1x512xf32>
    %253 = arith.cmpf oge, %220, %252 : vector<1x512xf32>
    %cst_124 = arith.constant 1.000000e+00 : f32
    %cst_125 = arith.constant 0.000000e+00 : f32
    %254 = vector.broadcast %cst_124 : f32 to vector<1x512xf32>
    %255 = vector.broadcast %cst_125 : f32 to vector<1x512xf32>
    %256 = arith.select %253, %254, %255 : vector<1x512xi1>, vector<1x512xf32>
    %cst_126 = arith.constant 1.000000e+00 : f32
    %257 = vector.broadcast %cst_126 : f32 to vector<1x512xf32>
    %258 = arith.addf %257, %256 : vector<1x512xf32>
    %cst_127 = arith.constant 6.500000e+00 : f32
    %259 = vector.broadcast %cst_127 : f32 to vector<1x512xf32>
    %260 = arith.cmpf ole, %220, %259 : vector<1x512xf32>
    %cst_128 = arith.constant 1.000000e+00 : f32
    %cst_129 = arith.constant 0.000000e+00 : f32
    %261 = vector.broadcast %cst_128 : f32 to vector<1x512xf32>
    %262 = vector.broadcast %cst_129 : f32 to vector<1x512xf32>
    %263 = arith.select %260, %261, %262 : vector<1x512xi1>, vector<1x512xf32>
    %264 = arith.addf %258, %263 : vector<1x512xf32>
    %265 = arith.mulf %237, %264 : vector<1x512xf32>
    %266 = vector.shape_cast %220 : vector<1x512xf32> to vector<1x512xf32>
    %267 = vector.broadcast %266 : vector<1x512xf32> to vector<16x512xf32>
    %cst_130 = arith.constant 5.000000e-01 : f32
    %268 = vector.broadcast %cst_130 : f32 to vector<16x512xf32>
    %269 = arith.cmpf oge, %267, %268 : vector<16x512xf32>
    %cst_131 = arith.constant 6.500000e+00 : f32
    %270 = vector.broadcast %cst_131 : f32 to vector<16x512xf32>
    %271 = arith.cmpf ole, %267, %270 : vector<16x512xf32>
    %c8_i32_132 = arith.constant 8 : i32
    %272 = tpu.dynamic_rotate %251 by %c8_i32_132 dim 1 : vector<16x512xf32>, i32 -> vector<16x512xf32>
    %c504_i32_133 = arith.constant 504 : i32
    %273 = tpu.dynamic_rotate %251 by %c504_i32_133 dim 1 : vector<16x512xf32>, i32 -> vector<16x512xf32>
    %cst_134 = arith.constant 0.000000e+00 : f32
    %274 = vector.broadcast %cst_134 : f32 to vector<16x512xf32>
    %275 = arith.select %269, %272, %274 : vector<16x512xi1>, vector<16x512xf32>
    %276 = arith.addf %251, %275 : vector<16x512xf32>
    %cst_135 = arith.constant 0.000000e+00 : f32
    %277 = vector.broadcast %cst_135 : f32 to vector<16x512xf32>
    %278 = arith.select %271, %273, %277 : vector<16x512xi1>, vector<16x512xf32>
    %279 = arith.addf %276, %278 : vector<16x512xf32>
    %cst_136 = arith.constant 5.000000e-01 : f32
    %280 = vector.broadcast %cst_136 : f32 to vector<1x512xf32>
    %281 = arith.cmpf oge, %212, %280 : vector<1x512xf32>
    %cst_137 = arith.constant 1.000000e+00 : f32
    %cst_138 = arith.constant 0.000000e+00 : f32
    %282 = vector.broadcast %cst_137 : f32 to vector<1x512xf32>
    %283 = vector.broadcast %cst_138 : f32 to vector<1x512xf32>
    %284 = arith.select %281, %282, %283 : vector<1x512xi1>, vector<1x512xf32>
    %cst_139 = arith.constant 1.000000e+00 : f32
    %285 = vector.broadcast %cst_139 : f32 to vector<1x512xf32>
    %286 = arith.addf %285, %284 : vector<1x512xf32>
    %cst_140 = arith.constant 6.500000e+00 : f32
    %287 = vector.broadcast %cst_140 : f32 to vector<1x512xf32>
    %288 = arith.cmpf ole, %212, %287 : vector<1x512xf32>
    %cst_141 = arith.constant 1.000000e+00 : f32
    %cst_142 = arith.constant 0.000000e+00 : f32
    %289 = vector.broadcast %cst_141 : f32 to vector<1x512xf32>
    %290 = vector.broadcast %cst_142 : f32 to vector<1x512xf32>
    %291 = arith.select %288, %289, %290 : vector<1x512xi1>, vector<1x512xf32>
    %292 = arith.addf %286, %291 : vector<1x512xf32>
    %293 = arith.mulf %265, %292 : vector<1x512xf32>
    %294 = vector.shape_cast %212 : vector<1x512xf32> to vector<1x512xf32>
    %295 = vector.broadcast %294 : vector<1x512xf32> to vector<16x512xf32>
    %cst_143 = arith.constant 5.000000e-01 : f32
    %296 = vector.broadcast %cst_143 : f32 to vector<16x512xf32>
    %297 = arith.cmpf oge, %295, %296 : vector<16x512xf32>
    %cst_144 = arith.constant 6.500000e+00 : f32
    %298 = vector.broadcast %cst_144 : f32 to vector<16x512xf32>
    %299 = arith.cmpf ole, %295, %298 : vector<16x512xf32>
    %c64_i32_145 = arith.constant 64 : i32
    %300 = tpu.dynamic_rotate %279 by %c64_i32_145 dim 1 : vector<16x512xf32>, i32 -> vector<16x512xf32>
    %c448_i32_146 = arith.constant 448 : i32
    %301 = tpu.dynamic_rotate %279 by %c448_i32_146 dim 1 : vector<16x512xf32>, i32 -> vector<16x512xf32>
    %cst_147 = arith.constant 0.000000e+00 : f32
    %302 = vector.broadcast %cst_147 : f32 to vector<16x512xf32>
    %303 = arith.select %297, %300, %302 : vector<16x512xi1>, vector<16x512xf32>
    %304 = arith.addf %279, %303 : vector<16x512xf32>
    %cst_148 = arith.constant 0.000000e+00 : f32
    %305 = vector.broadcast %cst_148 : f32 to vector<16x512xf32>
    %306 = arith.select %299, %301, %305 : vector<16x512xi1>, vector<16x512xf32>
    %307 = arith.addf %304, %306 : vector<16x512xf32>
    %308 = tpu.reciprocal %293 {approx = true} : vector<1x512xf32> -> vector<1x512xf32>
    %309 = vector.broadcast %308 : vector<1x512xf32> to vector<16x512xf32>
    %310 = arith.mulf %307, %309 : vector<16x512xf32>
    %311 = arith.addf %202, %310 : vector<16x512xf32>
    %c0_149 = arith.constant 0 : index
    %c48 = arith.constant 48 : index
    %c0_150 = arith.constant 0 : index
    %312 = vector.load %arg5[%c0_149, %c48, %c0_150] : memref<1x64x512xf32, #tpu.memory_space<vmem>>, vector<1x16x512xf32>
    %313 = vector.shape_cast %312 : vector<1x16x512xf32> to vector<16x512xf32>
    %314 = vector.shape_cast %311 : vector<16x512xf32> to vector<1x16x512xf32>
    tpu.vector_store %arg5[%c0_149, %c48, %c0_150], %314 {strides = array<i32>} : memref<1x64x512xf32, #tpu.memory_space<vmem>>, vector<1x16x512xf32>,
    return
  }
  func.func @transform_0(%arg0: i32) -> (i32, i32, i32) {
    %c0_i32 = arith.constant 0 : i32
    %c0_i32_0 = arith.constant 0 : i32
    %c0_i32_1 = arith.constant 0 : i32
    return %arg0, %c0_i32, %c0_i32_0 : i32, i32, i32
  }
  func.func @transform_1(%arg0: i32) -> (i32, i32, i32) {
    %c0_i32 = arith.constant 0 : i32
    %c0_i32_0 = arith.constant 0 : i32
    %c0_i32_1 = arith.constant 0 : i32
    return %arg0, %c0_i32, %c0_i32_0 : i32, i32, i32
  }
  func.func @transform_2(%arg0: i32) -> (i32, i32) {
    %c0_i32 = arith.constant 0 : i32
    %c0_i32_0 = arith.constant 0 : i32
    %c0_i32_1 = arith.constant 0 : i32
    return %c0_i32, %c0_i32_0 : i32, i32
  }
  func.func @transform_3(%arg0: i32) -> (i32, i32) {
    %c0_i32 = arith.constant 0 : i32
    %c0_i32_0 = arith.constant 0 : i32
    %c0_i32_1 = arith.constant 0 : i32
    return %c0_i32, %c0_i32_0 : i32, i32
  }
  func.func @transform_4(%arg0: i32) -> (i32, i32, i32) {
    %c0_i32 = arith.constant 0 : i32
    %c0_i32_0 = arith.constant 0 : i32
    %c0_i32_1 = arith.constant 0 : i32
    return %arg0, %c0_i32, %c0_i32_0 : i32, i32, i32
  }
}

</mosaic_0001>

<bundles_post_ra>
// kernel: tpu_custom_call.1
= control target key start
LH: loop header
LB: loop body
LE: loop exit
PB: predicated region body
PF: predicated region fallthrough
CT: control target
= control target key end

     0   :  { %9 = vsyncpa [#allocation4], 0  ;;  %s3267_s0 = inlined_call_operand.hbm [shape: f32[2,8,512], index: 0, kind: input, shape index: {}]   ;;  %s3268_s1 = inlined_call_operand.hbm [shape: f32[2,8,512], index: 1, kind: input, shape index: {}]   ;;  %s3269_s2 = inlined_call_operand.vmem [shape: bf16[32,16], index: 2, kind: input, shape index: {}]   ;;  %s3270_s3 = inlined_call_operand.vmem [shape: f32[32,1], index: 3, kind: input, shape index: {}]   ;;  %s3271_s4 = inlined_call_operand.hbm [shape: f32[2,64,512], index: 4, kind: output, shape index: {}]  }
   0x1   :  { %11 = vsyncpa [#allocation4 + $0x1], 0 }
   0x2   :  { %12 = vsyncpa [#allocation7], 0 }
   0x3   :  { %14 = vsyncpa [#allocation7 + $0x1], 0 }
   0x4   :  { %15 = vsyncpa [#allocation5], 0 }
   0x5   :  { %17 = vsyncpa [#allocation5 + $0x1], 0  ;;  %s1751_s15 = smov 0   ;;  %s1753_s16 = smov 0  }
   0x6   :  { %s1755_s17 = smov 0   ;;  %s1757_s18 = smov 0  }
   0x7 LB: > { %s1772_s19 = sadd.s32 4294967295, %s1712_s18   ;;  %s1482_s20 = sadd.s32 4294967294, %s1712_s18   ;;  %s1712_s18 = sphi %s1757_s18, %s3411_s18   ;;  %s1708_s17 = sphi %s1755_s17, %s3410_s17   ;;  %s1704_s16 = sphi %s1753_s16, %s3409_s16   ;;  %s1700_s15 = sphi %s1751_s15, %s3408_s15  }
   0x8   : > { %s1776_s21 = sadd.s32 1, %s1712_s18   ;;  %s30_s22 = sadd.s32 1, %s1708_s17 }
   0x9   : > { %s27_s23 = ssub.s32 %s1712_s18, %s1776_s21  ;;  %p37_p0 = scmp.ne.s32.totalorder %s1708_s17, %s1704_s16 }
   0xa   : > { %p28_p1 = scmp.eq.s32.totalorder %s27_s23, 0  ;;  %p38_p2 = scmp.eq.s32.totalorder %s1712_s18, 0 }
   0xb   : > { %p43_p3 = scmp.ne.s32.totalorder %s1704_s16, %s1700_s15  ;;  %p44_p4 = scmp.eq.s32.totalorder %s1772_s19, 0 }
   0xc   : > { %s1788_s24 = scalar_select %p28_p1, %s1708_s17, %s30_s22  }
   0xd   : > { %p1790_p5 = por %p38_p2, %p37_p0  ;;  %p1794_p6 = por %p44_p4, %p43_p3 }
   0xe   : > { %p135_p7 = scmp.eq.s32.totalorder %s1772_s19, 1  ;;  %p141_p8 = scmp.eq.s32.totalorder %s1482_s20, 1 }
   0xf   : > { %s3292_s26 = scalar_select %p1794_p6, 1, 0 }
  0x10   : > { %p1526_p10 = scmp.lt.s32.totalorder %s1712_s18, 2  ;;  %p1801_p11 = por %p135_p7, %p37_p0 }
  0x11   : > { %p1805_p12 = por %p141_p8, %p43_p3  ;;  %s1810_s29 = sand.u32 1, %s1708_s17  }
  0x12   : > { %s3293_s27 = scalar_select %p1801_p11, 1, 0 }
  0x13   : > { %s3294_s28 = scalar_select %p1805_p12, 1, 0 }
  0x14   : > { %s1506_s30 = sshll.u32 %s1712_s18, 9  ;;  %s1485_s5 = sshll.u32 %s1810_s29, 5 }
  0x15   : > { %s1819_s8 = scalar_lea.hbm %s3267_s0, %s1506_s30  ;;  %s171_s9 = scalar_lea.vmem [#allocation3], %s1485_s5 }
  0x16   : > { %s179_s10 = sshll.u32 %s171_s9, 4  ;;  %p1825_p13 = pnand %p1526_p10, %p1790_p5  ;;  %s1829_s10 = int_to_ptr.vmem [resolvable:$true] %s179_s10 }
  0x17   : > { %s168_s12 = scalar_lea.sflag [#allocation4], %s1810_s29  ;;  %s1582_s13 = scalar_lea.hbm %s1819_s8, 512 }
  0x18   : > { %p1583_p2 = scmp.ne.s32.totalorder %s1819_s8, %s1582_s13  ;;  %p1584_p3 = pneg %p1825_p13 }
  0x19   : > { %s1587_s22 = scalar_lea.hbm %s3267_s0, 1024  ;;  %p1588_p5 = scmp.lt.u32.totalorder %s1819_s8, %s3267_s0 }
  0x1a   : > { %p1585_p4 = pnand %p1584_p3, %p1583_p2  ;;  %p1589_p8 = scmp.lt.u32.totalorder %s1587_s22, %s1582_s13 }
  0x1b   : > { %p1591_p9 = scmp.lt.u32.totalorder %s1582_s13, %s1819_s8 }
  0x1c   : > { %p1586_p7 = pneg %p1585_p4  ;;  %p1590_p10 = por %p1589_p8, %p1588_p5 }
  0x1e   : > { %p1592_p0 = por %p1591_p9, %p1590_p10 }
  0x20   : > { %p1593_p1 = pnand %p1592_p0, %p1586_p7 }
  0x22   : > { %1596 = shalt.err (!%p1593_p1)
}
  0x23   : > { %s1597_s6 = scalar_lea.vmem %s1829_s10, 512  ;;  %s1714_s7 = smov [#allocation3]  }
  0x24   : > { %p1598_p2 = scmp.ne.s32.totalorder %s1829_s10, %s1597_s6  ;;  %s1602_s9 = sshll.u32 %s1714_s7, 4  ;;  %s1603_s9 = int_to_ptr.vmem [resolvable:$false] %s1602_s9 }
  0x25   : > { %s1604_s14 = scalar_lea.vmem %s1603_s9, 1024  ;;  %p1605_p11 = scmp.lt.s32.totalorder %s1829_s10, %s1603_s9 }
  0x26   : > { %p1600_p4 = pnand %p1598_p2, %p1584_p3  ;;  %p1606_p5 = scmp.lt.s32.totalorder %s1604_s14, %s1597_s6 }
  0x28   : > { %p1601_p12 = pneg %p1600_p4  ;;  %p1607_p8 = por %p1606_p5, %p1605_p11 }
  0x2a   : > { %p1608_p9 = pnand %p1607_p8, %p1601_p12 }
  0x2c   : > { %1611 = shalt.err (!%p1608_p9)
}
  0x2d   : > { %1518 = dma.hbm_to_vmem [thread:$0]  (!%p1825_p13), %s1819_s8, 512, %s1829_s10, %s168_s12  }
  0x2e   : > { %p3296_p0 = scmp.lt.s32.totalorder %s1712_s18, 3  ;;  %p3297_p1 = scmp.ge.s32.totalorder %s1712_s18, 1 }
  0x2f   : > { %s1872_s23 = scalar_lea.hbm %s3268_s1, %s1506_s30  ;;  %s190_s25 = scalar_lea.vmem [#allocation6], %s1485_s5 }
  0x30   : > { %p1863_p7 = pnand %p3297_p1, %p3296_p0  ;;  %s198_s6 = sshll.u32 %s190_s25, 4  ;;  %s199_s6 = int_to_ptr.vmem [resolvable:$true] %s198_s6 }
  0x31   : > { %s187_s8 = scalar_lea.sflag [#allocation7], %s1810_s29  ;;  %s1612_s10 = scalar_lea.hbm %s1872_s23, 512 }
  0x32   : > { %s3298_s13 = scalar_select %p1863_p7, 1, 0 }
  0x33   : > { %p1613_p11 = scmp.ne.s32.totalorder %s1872_s23, %s1612_s10  ;;  %s1617_s30 = scalar_lea.hbm %s3268_s1, 1024 }
  0x34   : > { %p1618_p2 = scmp.lt.u32.totalorder %s1872_s23, %s3268_s1  ;;  %p1619_p4 = scmp.lt.u32.totalorder %s1617_s30, %s1612_s10 }
  0x35   : > { %p1615_p12 = pnand %p1613_p11, %p1584_p3  ;;  %p1621_p8 = scmp.lt.u32.totalorder %s1612_s10, %s1872_s23 }
  0x36   : > { %p1620_p5 = por %p1619_p4, %p1618_p2 }
  0x37   : > { %p1616_p10 = pneg %p1615_p12 }
  0x38   : > { %p1622_p9 = por %p1621_p8, %p1620_p5 }
  0x3a   : > { %p1623_p0 = pnand %p1622_p9, %p1616_p10 }
  0x3c   : > { %1626 = shalt.err (!%p1623_p0)
}
  0x3d   : > { %s1627_s29 = scalar_lea.vmem %s199_s6, 512  ;;  %s1715_s5 = smov [#allocation6]  }
  0x3e   : > { %p1628_p1 = scmp.ne.s32.totalorder %s199_s6, %s1627_s29  ;;  %s1632_s20 = sshll.u32 %s1715_s5, 4  ;;  %s1633_s20 = int_to_ptr.vmem [resolvable:$false] %s1632_s20 }
  0x3f   : > { %s1634_s22 = scalar_lea.vmem %s1633_s20, 1024  ;;  %p1635_p6 = scmp.lt.s32.totalorder %s199_s6, %s1633_s20 }
  0x40   : > { %p1630_p11 = pnand %p1628_p1, %p1584_p3  ;;  %p1636_p7 = scmp.lt.s32.totalorder %s1634_s22, %s1627_s29 }
  0x42   : > { %p1631_p12 = pneg %p1630_p11  ;;  %p1637_p2 = por %p1636_p7, %p1635_p6 }
  0x44   : > { %p1638_p4 = pnand %p1637_p2, %p1631_p12 }
  0x46   : > { %1641 = shalt.err (!%p1638_p4)
}
  0x47   : > { %1521 = dma.hbm_to_vmem [thread:$0]  (!%p1825_p13), %s1872_s23, 512, %s199_s6, %s187_s8  }
  0x48   : > { %p3299_p10 = scmp.ne.s32.totalorder %s3298_s13, 0 }
  0x49   : > { %s1899_s25 = sand.u32 (!%p3299_p10), 1, %s1704_s16   ;;  %p3300_p3 = scmp.ne.s32.totalorder (!%p3299_p10), %s3292_s26, 0 }
  0x4a   : > { %207 = sbr.rel (%p3299_p10) target bundleno = 1167 (0x48f), region = 36  ;;  %s1492_s10 = sshll.u32 (!%p3299_p10), %s1899_s25, 5 }
  0x4b   : > { %s210_s12 = scalar_lea.sflag (!%p3299_p10), [#allocation4], %s1899_s25  ;;  %s213_s7 = scalar_lea.vmem (!%p3299_p10), [#allocation3], %s1492_s10 }
  0x51   : > { %1687 = dma.done.wait (%p3300_p3), %s210_s12, 512  }
  0x52   : > { %1689 = vsyncadd (%p3300_p3), %s210_s12, 4294966784  ;;  %s219_s11 = scalar_lea.sflag [#allocation7], %s1899_s25  ;;  %s222_s23 = scalar_lea.vmem [#allocation6], %s1492_s10 }
  0x53   : > { %1691 = dma.done.wait (%p3300_p3), %s219_s11, 512  }
  0x54   : > { %1693 = vsyncadd (%p3300_p3), %s219_s11, 4294966784  ;;  %v1716_v0 = vmov 0   ;;  %v254_v1 = vld [vmem:[%s213_s7 + $0x8] sm:$0xff]  ;;  %v256_v3 = vld [vmem:[%s213_s7 + $0x18] sm:$0xff]  ;;  %vm311_vm0 = vcmask 130048   ;;  %s1717_s5 = smov 1   ;;  %v480_v43 = vlaneseq }
  0x55   : > { %350 = vmatprep.mubr.bf16.mxu0 %v1716_v0  ;;  %403 = vmatprep.mubr.bf16.mxu1 %v1716_v0  ;;  %v262_v2 = vld [vmem:[%s222_s23 + $0x8] sm:$0xff]  ;;  %v258_v4 = vmax.f32 %v254_v1, 0.0  ;;  %v260_v6 = vmax.f32 %v256_v3, 0.0  ;;  %v264_v7 = vld [vmem:[%s222_s23 + $0x18] sm:$0xff]  ;;  %v253_v8 = vld [vmem:[%s213_s7] sm:$0xff]  ;;  %s1718_s20 = smov 127  }
  0x56   : > { %1569 = vset.pattern.permute.xlu0 %v1716_v0  ;;  %1570 = vset.pattern.permute.xlu1 %v1716_v0  ;;  %v266_v5 = vmax.f32 %v262_v2, 0.0  ;;  %v261_v9 = vld [vmem:[%s222_s23] sm:$0xff]  ;;  %v268_v10 = vmax.f32 %v264_v7, 0.0  ;;  %v257_v11 = vmax.f32 %v253_v8, 0.0  ;;  %v255_v13 = vld [vmem:[%s213_s7 + $0x10] sm:$0xff]  ;;  %v278_v23 = vld [vmem:[%s3270_s3 + $0x8] sm:$0xff] }
  0x57   : > { %v265_v12 = vmax.f32 %v261_v9, 0.0  ;;  %v263_v14 = vld [vmem:[%s222_s23 + $0x10] sm:$0xff]  ;;  %v259_v16 = vmax.f32 %v255_v13, 0.0  ;;  %v277_v20 = vld [vmem:[%s3270_s3] sm:$0xff]  ;;  %v1572_v24 = vld [vmem:[%s3269_s2 + $0x8] sm:$0xff]   ;;  %v1972_v44 = vand.u32 127, %v480_v43 }
  0x58   : > { %v274_v15 = vpack.c.bf16 %v266_v5, %v258_v4  ;;  %v267_v17 = vmax.f32 %v263_v14, 0.0  ;;  %v276_v18 = vpack.c.bf16 %v268_v10, %v260_v6  ;;  %v1571_v22 = vld [vmem:[%s3269_s2] sm:$0xff]   ;;  %283 = vperm.xlu0 %1569, %v277_v20   ;;  %s1719_s22 = smov 8   ;;  %s1720_s10 = smov 120  }
  0x59   : > { %v273_v19 = vpack.c.bf16 %v265_v12, %v257_v11  ;;  %v482_v45 = vadd.s32 128, %v1972_v44  ;;  %v485_v46 = vcvt.s32.f32 %v1972_v44  ;;  %v483_v47 = vadd.s32 256, %v1972_v44  ;;  %s1721_s26 = smov 64   ;;  %s1494_s13 = sshll.u32 %s1899_s25, 8 }
  0x5a   : > { %318 = vmatprep.subr.bf16.mxu0 %v274_v15  ;;  %v275_v21 = vpack.c.bf16 %v267_v17, %v259_v16  ;;  %371 = vmatprep.subr.bf16.mxu1 %v276_v18  ;;  %v484_v52 = vadd.s32 384, %v1972_v44  ;;  %vm3274_vm2 = vcmp.lt.s32.totalorder %v1972_v44, 1  ;;  %vm3275_vm3 = vcmp.lt.s32.totalorder %v1972_v44, 127  ;;  %s2313_s6 = scalar_lea.vmem [#allocation8], %s1494_s13  ;;  %s1508_s8 = sshll.u32 %s1772_s19, 12 }
  0x5b   : > { %319 = vmatpush1.bf16.msra.mxu0 %v273_v19  ;;  %v486_v48 = vcvt.s32.f32 %v482_v45  ;;  %v489_v49 = vadd.f32 0.5, %v485_v46  ;;  %v487_v50 = vcvt.s32.f32 %v483_v47  ;;  %vm3280_vm11 = vcmp.lt.s32.totalorder %v1972_v44, 8  ;;  %s1386_s30 = sshll.u32 %s2313_s6, 4  ;;  %s3216_s14 = scalar_lea.hbm %s3271_s4, %s1508_s8  ;;  %s3218_s30 = int_to_ptr.vmem [resolvable:$true] %s1386_s30 }
  0x5c   : > { %372 = vmatpush1.bf16.msra.mxu1 %v275_v21  ;;  %288 = vperm.xlu0 %1569, %v278_v23   ;;  %v488_v56 = vcvt.s32.f32 %v484_v52  ;;  %vm3278_vm13 = vcmp.lt.s32.totalorder %v1972_v44, 120  ;;  %s1373_s29 = scalar_lea.sflag [#allocation5], %s1899_s25  ;;  %p3405_p13 = scmp.ne.s32.totalorder %s3293_s27, 0 }
  0x5d   : > { %v490_v51 = vadd.f32 0.5, %v486_v48  ;;  %v494_v53 = vmul.f32 0.015625, %v489_v49  ;;  %v491_v54 = vadd.f32 0.5, %v487_v50 }
  0x5e   : > { %1497 = vmatmul.mubr.msk.bf16.vlgmr.msra.gmra.mrb[0].mxu0 %vm311_vm0, %v1571_v22  ;;  %v492_v60 = vadd.f32 0.5, %v488_v56 }
  0x5f   : > { %1499 = vmatmul.mubr.msk.bf16.vlgmr.msra.gmra.mrb[0].mxu1 %vm311_vm0, %v1571_v22  ;;  %360 = vmatprep.mubr.bf16.mxu0 %v1716_v0  ;;  %v495_v55 = vmul.f32 0.015625, %v490_v51  ;;  %v1978_v57 = vfloor.f32 %v494_v53  ;;  %v496_v58 = vmul.f32 0.015625, %v491_v54 }
  0x60   : > { %413 = vmatprep.mubr.bf16.mxu1 %v1716_v0  ;;  %v497_v0 = vmul.f32 0.015625, %v492_v60 }
  0x61   : > { %v1980_v59 = vfloor.f32 %v495_v55  ;;  %v502_v61 = vmul.f32 64.0, %v1978_v57  ;;  %v1983_v62 = vfloor.f32 %v496_v58 }
  0x62   : > { %v1987_v4 = vfloor.f32 %v497_v0 }
  0x63   : > { %v503_v63 = vmul.f32 64.0, %v1980_v59  ;;  %v506_v1 = vsub.f32 %v485_v46, %v502_v61  ;;  %v504_v2 = vmul.f32 64.0, %v1983_v62 }
  0x64   : > { %v505_v9 = vmul.f32 64.0, %v1987_v4 }
  0x65   : > { %v507_v3 = vsub.f32 %v486_v48, %v503_v63  ;;  %v510_v5 = vadd.f32 0.5, %v506_v1  ;;  %v508_v6 = vsub.f32 %v487_v50, %v504_v2 }
  0x66   : > { %1498 = vmatmul.mubr.msk.bf16.gmra.mrb[4].mxu0 %vm311_vm0, %v1572_v24  ;;  %v509_v15 = vsub.f32 %v488_v56, %v505_v9 }
  0x67   : > { %1500 = vmatmul.mubr.msk.bf16.gmra.mrb[4].mxu1 %vm311_vm0, %v1572_v24  ;;  %v511_v8 = vadd.f32 0.5, %v507_v3  ;;  %v515_v10 = vmul.f32 0.125, %v510_v5  ;;  %v512_v12 = vadd.f32 0.5, %v508_v6 }
  0x68   : > { %v513_v21 = vadd.f32 0.5, %v509_v15 }
  0x69   : > { %v516_v14 = vmul.f32 0.125, %v511_v8  ;;  %v1990_v16 = vfloor.f32 %v515_v10  ;;  %v517_v18 = vmul.f32 0.125, %v512_v12 }
  0x6b   : > { %v1996_v20 = vfloor.f32 %v516_v14  ;;  %v523_v22 = vmul.f32 8.0, %v1990_v16  ;;  %v1999_v24 = vfloor.f32 %v517_v18  ;;  %vm3277_vm12 = vcmp.ge.f32.partialorder %v1990_v16, 0.5 }
  0x6c   : > { %vm649_vm15 = vcmp.le.f32.partialorder %v1990_v16, 6.5 }
  0x6d   : > { %vm3279_vm14 = vcmp.ge.f32.partialorder %v1996_v20, 0.5  ;;  %vm3283_vm0 = vcmp.ge.f32.partialorder %v1999_v24, 0.5 }
  0xd7   : > { %v284_v25 = vpop.permute.xlu0 %283 }
  0xdb   : > { %v289_v35 = vpop.permute.xlu0 %288 }
 0x131   : > { %v352_v26 = vpop.f32.mrb[0].mxu0 }
 0x132   : > { %v1924_v27 = vadd.f32 %v352_v26, %v284_v25  ;;  %v405_v28 = vpop.f32.mrb[0].mxu1  ;;  %v354_v29 = vpop.f32.mrb[1].mxu0 }
 0x133   : > { %v1926_v30 = vadd.f32 %v405_v28, %v284_v25  ;;  %v407_v31 = vpop.f32.mrb[1].mxu1  ;;  %v356_v32 = vpop.f32.mrb[2].mxu0  ;;  %v1944_v39 = vadd.f32 %v354_v29, %v284_v25  ;;  %v518_v28 = vmul.f32 0.125, %v513_v21  ;;  %v2004_v29 = vsub.f32 %v506_v1, %v523_v22 }
 0x134   : > { %v409_v33 = vpop.f32.mrb[2].mxu1  ;;  %v358_v34 = vpop.f32.mrb[3].mxu0  ;;  %555 = vrot.lane.b32.xlu1 %v1924_v27, %s1717_s5  ;;  %v1932_v37 = vadd.f32 %v356_v32, %v289_v35  ;;  %v1950_v40 = vadd.f32 %v407_v31, %v284_v25  ;;  %v524_v25 = vmul.f32 8.0, %v1996_v20  ;;  %v525_v32 = vmul.f32 8.0, %v1999_v24 }
 0x135   : > { %v411_v36 = vpop.f32.mrb[3].mxu1  ;;  %563 = vrot.lane.b32.xlu0 %v1926_v30, %s1717_s5  ;;  %v1938_v38 = vadd.f32 %v409_v33, %v289_v35  ;;  %v1956_v41 = vadd.f32 %v358_v34, %v289_v35  ;;  %v2009_v34 = vfloor.f32 %v518_v28  ;;  %vm531_vm1 = vcmp.ge.f32.partialorder %v2004_v29, 0.5 }
 0x136   : > { %v1962_v42 = vadd.f32 %v411_v36, %v289_v35  ;;  %v2007_v33 = vsub.f32 %v507_v3, %v524_v25  ;;  %v2015_v45 = vsub.f32 %v508_v6, %v525_v32  ;;  %vm543_vm5 = vcmp.le.f32.partialorder %v2004_v29, 6.5 }
 0x137   : > { %v526_v48 = vmul.f32 8.0, %v2009_v34 }
 0x138   : > { %557 = vrot.lane.b32.xlu1 %v1932_v37, %s1717_s5  ;;  %vm532_vm4 = vcmp.ge.f32.partialorder %v2007_v33, 0.5  ;;  %vm544_vm6 = vcmp.le.f32.partialorder %v2007_v33, 6.5  ;;  %vm3284_vm7 = vcmp.ge.f32.partialorder %v2015_v45, 0.5  ;;  %vm545_vm8 = vcmp.le.f32.partialorder %v2015_v45, 6.5 }
 0x139   : > { %580 = vrot.lane.b32.xlu0 %v1924_v27, %s1718_s20  ;;  %v2039_v58 = vsub.f32 %v509_v15, %v526_v48 }
 0x13b   : > { %vm3281_vm9 = vcmp.ge.f32.partialorder %v2039_v58, 0.5  ;;  %vm3276_vm10 = vcmp.le.f32.partialorder %v2039_v58, 6.5 }
 0x13c   : > { %565 = vrot.lane.b32.xlu1 %v1938_v38, %s1717_s5 }
 0x13d   : > { %588 = vrot.lane.b32.xlu0 %v1926_v30, %s1718_s20 }
 0x140   : > { %582 = vrot.lane.b32.xlu1 %v1932_v37, %s1718_s20 }
 0x141   : > { %559 = vrot.lane.b32.xlu0 %v1944_v39, %s1717_s5 }
 0x144   : > { %590 = vrot.lane.b32.xlu1 %v1938_v38, %s1718_s20 }
 0x145   : > { %567 = vrot.lane.b32.xlu0 %v1950_v40, %s1717_s5 }
 0x148   : > { %561 = vrot.lane.b32.xlu1 %v1956_v41, %s1717_s5 }
 0x149   : > { %584 = vrot.lane.b32.xlu0 %v1944_v39, %s1718_s20 }
 0x14c   : > { %569 = vrot.lane.b32.xlu1 %v1962_v42, %s1717_s5 }
 0x14d   : > { %592 = vrot.lane.b32.xlu0 %v1950_v40, %s1718_s20 }
 0x150   : > { %586 = vrot.lane.b32.xlu1 %v1956_v41, %s1718_s20 }
 0x154   : > { %594 = vrot.lane.b32.xlu1 %v1962_v42, %s1718_s20 }
 0x1a6   : > { %v556_v7 = vpop.permute.xlu1 %555 }
 0x1a7   : > { %v564_v11 = vpop.permute.xlu0 %563 }
 0x1aa   : > { %v558_v13 = vpop.permute.xlu1 %557 }
 0x1ab   : > { %v1992_v17 = vpop.permute.xlu0 %580 }
 0x1ae   : > { %v1994_v19 = vpop.permute.xlu1 %565 }
 0x1af   : > { %v589_v23 = vpop.permute.xlu0 %588 }
 0x1b2   : > { %v2002_v26 = vpop.permute.xlu1 %582 }
 0x1b3   : > { %v560_v31 = vpop.permute.xlu0 %559 }
 0x1b4   : > { %v576_v47 = vsel %vm3274_vm2, %v556_v7, %v560_v31  ;;  %v574_v56 = vsel %vm3274_vm2, %v560_v31, %v564_v11 }
 0x1b5   : > { %v606_v54 = vsel %vm532_vm4, %v576_v47, 0.0  ;;  %v607_v6 = vsel %vm3284_vm7, %v574_v56, 0.0 }
 0x1b6   : > { %v591_v35 = vpop.permute.xlu1 %590  ;;  %v614_v2 = vadd.f32 %v606_v54, %v1944_v39  ;;  %v615_v18 = vadd.f32 %v607_v6, %v1926_v30 }
 0x1b7   : > { %v568_v36 = vpop.permute.xlu0 %567 }
 0x1b8   : > { %v578_v43 = vsel %vm3274_vm2, %v568_v36, %v556_v7  ;;  %v572_v8 = vsel %vm3274_vm2, %v564_v11, %v568_v36 }
 0x1b9   : > { %v605_v46 = vsel %vm531_vm1, %v578_v43, 0.0 }
 0x1ba   : > { %v562_v49 = vpop.permute.xlu1 %561  ;;  %v613_v51 = vadd.f32 %v605_v46, %v1924_v27 }
 0x1bb   : > { %v585_v50 = vpop.permute.xlu0 %584  ;;  %v577_v7 = vsel %vm3274_vm2, %v558_v13, %v562_v49  ;;  %v575_v25 = vsel %vm3274_vm2, %v562_v49, %v1994_v19 }
 0x1bc   : > { %v599_v52 = vsel %vm3275_vm3, %v585_v50, %v589_v23  ;;  %v601_v53 = vsel %vm3275_vm3, %v1992_v17, %v585_v50  ;;  %v610_v11 = vsel %vm532_vm4, %v577_v7, 0.0  ;;  %v611_v48 = vsel %vm3284_vm7, %v575_v25, 0.0 }
 0x1bd   : > { %v621_v55 = vsel %vm543_vm5, %v601_v53, 0.0  ;;  %v622_v63 = vsel %vm544_vm6, %v599_v52, 0.0  ;;  %v618_v36 = vadd.f32 %v610_v11, %v1956_v41  ;;  %v619_v52 = vadd.f32 %v611_v48, %v1938_v38 }
 0x1be   : > { %v570_v60 = vpop.permute.xlu1 %569  ;;  %v2041_v61 = vadd.f32 %v621_v55, %v613_v51  ;;  %v2063_v10 = vadd.f32 %v622_v63, %v614_v2  ;;  %v2146_v63 = vpop.f32.mrb[4].mxu1  ;;  %v279_v2 = vld [vmem:[%s3270_s3 + $0x10] sm:$0xff] }
 0x1bf   : > { %v593_v0 = vpop.permute.xlu0 %592  ;;  %v579_v1 = vsel %vm3274_vm2, %v570_v60, %v558_v13  ;;  %v573_v49 = vsel %vm3274_vm2, %v1994_v19, %v570_v60  ;;  %v2144_v60 = vpop.f32.mrb[4].mxu0  ;;  %vm3282_vm2 = vcmp.le.f32.partialorder %v1996_v20, 6.5 }
 0x1c0   : > { %v597_v3 = vsel %vm3275_vm3, %v589_v23, %v593_v0  ;;  %v609_v5 = vsel %vm531_vm1, %v579_v1, 0.0  ;;  %665 = vrot.lane.b32.xlu0 %v2041_v61, %s1719_s22  ;;  %v603_v21 = vsel %vm3275_vm3, %v593_v0, %v1992_v17  ;;  %v608_v23 = vsel %vm3281_vm9, %v572_v8, 0.0  ;;  %v2150_v0 = vpop.f32.mrb[5].mxu0  ;;  %v2152_v1 = vpop.f32.mrb[5].mxu1 }
 0x1c1   : > { %v623_v12 = vsel %vm545_vm8, %v597_v3, 0.0  ;;  %v617_v14 = vadd.f32 %v609_v5, %v1932_v37  ;;  %v624_v43 = vsel %vm3276_vm10, %v603_v21, 0.0  ;;  %v616_v47 = vadd.f32 %v608_v23, %v1950_v40  ;;  %v280_v3 = vld [vmem:[%s3270_s3 + $0x18] sm:$0xff]  ;;  %v2166_v5 = vpop.f32.mrb[6].mxu0  ;;  %v2168_v6 = vpop.f32.mrb[6].mxu1 }
 0x1c2   : > { %v587_v9 = vpop.permute.xlu1 %586  ;;  %v2092_v17 = vadd.f32 %v623_v12, %v615_v18  ;;  %v612_v54 = vsel %vm3281_vm9, %v573_v49, 0.0  ;;  %v2170_v7 = vpop.f32.mrb[7].mxu0 }
 0x1c3   : > { %v600_v15 = vsel %vm3275_vm3, %v587_v9, %v591_v35  ;;  %v602_v13 = vsel %vm3275_vm3, %v2002_v26, %v587_v9  ;;  %v2113_v51 = vadd.f32 %v624_v43, %v616_v47  ;;  %v620_v56 = vadd.f32 %v612_v54, %v1962_v42  ;;  %v2172_v8 = vpop.f32.mrb[7].mxu1 }
 0x1c4   : > { %v625_v22 = vsel %vm543_vm5, %v602_v13, 0.0  ;;  %669 = vrot.lane.b32.xlu0 %v2063_v10, %s1719_s22  ;;  %v626_v31 = vsel %vm544_vm6, %v600_v15, 0.0 }
 0x1c5   : > { %v2088_v28 = vadd.f32 %v625_v22, %v617_v14  ;;  %v2109_v50 = vadd.f32 %v626_v31, %v618_v36 }
 0x1c6   : > { %v595_v32 = vpop.permute.xlu1 %594 }
 0x1c7   : > { %v598_v46 = vsel %vm3275_vm3, %v591_v35, %v595_v32  ;;  %667 = vrot.lane.b32.xlu1 %v2088_v28, %s1719_s22  ;;  %v604_v53 = vsel %vm3275_vm3, %v595_v32, %v2002_v26  ;;  %vm640_vm3 = vcmp.ge.f32.partialorder %v2009_v34, 0.5 }
 0x1c8   : > { %673 = vrot.lane.b32.xlu0 %v2092_v17, %s1719_s22  ;;  %v627_v35 = vsel %vm545_vm8, %v598_v46, 0.0  ;;  %v628_v55 = vsel %vm3276_vm10, %v604_v53, 0.0  ;;  %vm3285_vm10 = vcmp.le.f32.partialorder %v1999_v24, 6.5 }
 0x1c9   : > { %v2125_v19 = vadd.f32 %v627_v35, %v619_v52  ;;  %v2134_v26 = vadd.f32 %v628_v55, %v620_v56 }
 0x1cb   : > { %671 = vrot.lane.b32.xlu1 %v2109_v50, %s1719_s22 }
 0x1cc   : > { %677 = vrot.lane.b32.xlu0 %v2113_v51, %s1719_s22 }
 0x1cf   : > { %675 = vrot.lane.b32.xlu1 %v2125_v19, %s1719_s22 }
 0x1d0   : > { %690 = vrot.lane.b32.xlu0 %v2041_v61, %s1720_s10 }
 0x1d3   : > { %679 = vrot.lane.b32.xlu1 %v2134_v26, %s1719_s22 }
 0x1d4   : > { %694 = vrot.lane.b32.xlu0 %v2063_v10, %s1720_s10 }
 0x1d7   : > { %692 = vrot.lane.b32.xlu1 %v2088_v28, %s1720_s10 }
 0x1d8   : > { %698 = vrot.lane.b32.xlu0 %v2092_v17, %s1720_s10 }
 0x1db   : > { %696 = vrot.lane.b32.xlu1 %v2109_v50, %s1720_s10 }
 0x1dc   : > { %702 = vrot.lane.b32.xlu0 %v2113_v51, %s1720_s10 }
 0x1df   : > { %700 = vrot.lane.b32.xlu1 %v2125_v19, %s1720_s10 }
 0x1e0   : > { %293 = vperm.xlu0 %1569, %v279_v2  }
 0x1e3   : > { %704 = vrot.lane.b32.xlu1 %v2134_v26, %s1720_s10 }
 0x1e7   : > { %298 = vperm.xlu1 %1570, %v280_v3  }
 0x232   : > { %v666_v9 = vpop.permute.xlu0 %665 }
 0x236   : > { %v670_v12 = vpop.permute.xlu0 %669 }
 0x237   : > { %v686_v25 = vsel %vm3280_vm11, %v666_v9, %v670_v12 }
 0x238   : > { %v716_v46 = vsel %vm3279_vm14, %v686_v25, 0.0 }
 0x239   : > { %v668_v14 = vpop.permute.xlu1 %667  ;;  %v724_v53 = vadd.f32 %v716_v46, %v2063_v10 }
 0x23a   : > { %v674_v15 = vpop.permute.xlu0 %673 }
 0x23b   : > { %v684_v47 = vsel %vm3280_vm11, %v670_v12, %v674_v15 }
 0x23c   : > { %v717_v54 = vsel %vm3283_vm0, %v684_v47, 0.0 }
 0x23d   : > { %v672_v13 = vpop.permute.xlu1 %671 }
 0x23e   : > { %v678_v18 = vpop.permute.xlu0 %677  ;;  %v687_v2 = vsel %vm3280_vm11, %v668_v14, %v672_v13 }
 0x23f   : > { %v688_v11 = vsel %vm3280_vm11, %v678_v18, %v666_v9  ;;  %v682_v10 = vsel %vm3280_vm11, %v674_v15, %v678_v18 }
 0x240   : > { %v715_v23 = vsel %vm3277_vm12, %v688_v11, 0.0  ;;  %v725_v11 = vadd.f32 %v717_v54, %v2092_v17 }
 0x241   : > { %v676_v21 = vpop.permute.xlu1 %675  ;;  %v723_v36 = vadd.f32 %v715_v23, %v2041_v61 }
 0x242   : > { %v691_v22 = vpop.permute.xlu0 %690 }
 0x245   : > { %v680_v31 = vpop.permute.xlu1 %679 }
 0x246   : > { %v695_v32 = vpop.permute.xlu0 %694  ;;  %v689_v49 = vsel %vm3280_vm11, %v680_v31, %v668_v14 }
 0x247   : > { %v711_v43 = vsel %vm3278_vm13, %v691_v22, %v695_v32  ;;  %v719_v55 = vsel %vm3277_vm12, %v689_v49, 0.0  ;;  %vm3286_vm12 = vcmp.le.f32.partialorder %v2009_v34, 6.5 }
 0x248   : > { %v731_v48 = vsel %vm649_vm15, %v711_v43, 0.0  ;;  %v727_v23 = vadd.f32 %v719_v55, %v2088_v28  ;;  %v718_v28 = vsel %vm640_vm3, %v682_v10, 0.0 }
 0x249   : > { %v2197_v35 = vadd.f32 %v731_v48, %v723_v36  ;;  %v693_v61 = vpop.permute.xlu1 %692  ;;  %v685_v36 = vsel %vm3280_vm11, %v672_v13, %v676_v21  ;;  %v726_v13 = vadd.f32 %v718_v28, %v2113_v51 }
 0x24a   : > { %v699_v52 = vpop.permute.xlu0 %698 }
 0x24b   : > { %v709_v56 = vsel %vm3278_vm13, %v695_v32, %v699_v52  ;;  %775 = vrot.lane.b32.xlu0 %v2197_v35, %s1721_s26  ;;  %v720_v32 = vsel %vm3279_vm14, %v687_v2, 0.0 }
 0x24c   : > { %v732_v3 = vsel %vm3282_vm2, %v709_v56, 0.0  ;;  %v728_v48 = vadd.f32 %v720_v32, %v2109_v50  ;;  %v683_v50 = vsel %vm3280_vm11, %v676_v21, %v680_v31  ;;  %vm749_vm11 = vcmp.ge.f32.partialorder %v1983_v62, 0.5 }
 0x24d   : > { %v2216_v9 = vadd.f32 %v732_v3, %v724_v53  ;;  %v697_v12 = vpop.permute.xlu1 %696  ;;  %v721_v53 = vsel %vm3283_vm0, %v685_v36, 0.0  ;;  %v722_v21 = vsel %vm640_vm3, %v683_v50, 0.0 }
 0x24e   : > { %v703_v14 = vpop.permute.xlu0 %702  ;;  %v712_v25 = vsel %vm3278_vm13, %v693_v61, %v697_v12  ;;  %v729_v51 = vadd.f32 %v721_v53, %v2125_v19 }
 0x24f   : > { %v707_v15 = vsel %vm3278_vm13, %v699_v52, %v703_v14  ;;  %v713_v18 = vsel %vm3278_vm13, %v703_v14, %v691_v22  ;;  %v735_v17 = vsel %vm649_vm15, %v712_v25, 0.0  ;;  %779 = vrot.lane.b32.xlu0 %v2216_v9, %s1721_s26 }
 0x250   : > { %v733_v43 = vsel %vm3285_vm10, %v707_v15, 0.0  ;;  %v2240_v46 = vadd.f32 %v735_v17, %v727_v23  ;;  %v734_v49 = vsel %vm3286_vm12, %v713_v18, 0.0 }
 0x251   : > { %v2242_v47 = vadd.f32 %v733_v43, %v725_v11  ;;  %v701_v22 = vpop.permute.xlu1 %700  ;;  %v2262_v56 = vadd.f32 %v734_v49, %v726_v13  ;;  %v730_v11 = vadd.f32 %v722_v21, %v2134_v26 }
 0x252   : > { %v710_v52 = vsel %vm3278_vm13, %v697_v12, %v701_v22  ;;  %777 = vrot.lane.b32.xlu1 %v2240_v46, %s1721_s26 }
 0x253   : > { %v736_v54 = vsel %vm3282_vm2, %v710_v52, 0.0  ;;  %783 = vrot.lane.b32.xlu0 %v2242_v47, %s1721_s26 }
 0x254   : > { %v2260_v55 = vadd.f32 %v736_v54, %v728_v48 }
 0x255   : > { %v705_v2 = vpop.permute.xlu1 %704 }
 0x256   : > { %v708_v3 = vsel %vm3278_vm13, %v701_v22, %v705_v2  ;;  %v714_v10 = vsel %vm3278_vm13, %v705_v2, %v693_v61  ;;  %781 = vrot.lane.b32.xlu1 %v2260_v55, %s1721_s26  ;;  %vm748_vm13 = vcmp.ge.f32.partialorder %v1980_v59, 0.5 }
 0x257   : > { %v737_v31 = vsel %vm3285_vm10, %v708_v3, 0.0  ;;  %787 = vrot.lane.b32.xlu0 %v2262_v56, %s1721_s26  ;;  %v738_v19 = vsel %vm3286_vm12, %v714_v10, 0.0 }
 0x258   : > { %v2277_v12 = vadd.f32 %v737_v31, %v729_v51  ;;  %v2284_v61 = vadd.f32 %v738_v19, %v730_v11 }
 0x25a   : > { %785 = vrot.lane.b32.xlu1 %v2277_v12, %s1721_s26 }
 0x25e   : > { %789 = vrot.lane.b32.xlu1 %v2284_v61, %s1721_s26 }
 0x25f   : > { %v294_v23 = vpop.permute.xlu0 %293 }
 0x260   : > { %v2290_v14 = vadd.f32 %v2144_v60, %v294_v23  ;;  %v2293_v25 = vadd.f32 %v2150_v0, %v294_v23  ;;  %v2296_v32 = vadd.f32 %v2146_v63, %v294_v23  ;;  %v2299_v26 = vadd.f32 %v2152_v1, %v294_v23 }
 0x262   : > { %v456_v15 = vadd.f32 %v2290_v14, %v1924_v27  ;;  %v2305_v18 = vadd.f32 %v2293_v25, %v1944_v39  ;;  %v458_v60 = vadd.f32 %v2296_v32, %v1926_v30  ;;  %v459_v0 = vadd.f32 %v2299_v26, %v1950_v40  ;;  %876 = vrot.lane.b32.xlu0 %v2290_v14, %s1717_s5 }
 0x264   : > { %464 = vst [vmem:[%s2313_s6] sm:$0xff] %v456_v15  ;;  %465 = vst [vmem:[%s2313_s6 + $0x8] sm:$0xff] %v2305_v18 }
 0x265   : > { %466 = vst [vmem:[%s2313_s6 + $0x10] sm:$0xff] %v458_v60  ;;  %467 = vst [vmem:[%s2313_s6 + $0x18] sm:$0xff] %v459_v0 }
 0x266   : > { %880 = vrot.lane.b32.xlu0 %v2293_v25, %s1717_s5  ;;  %v299_v27 = vpop.permute.xlu1 %298 }
 0x267   : > { %v2323_v30 = vadd.f32 %v2166_v5, %v299_v27  ;;  %v2326_v39 = vadd.f32 %v2170_v7, %v299_v27  ;;  %v2329_v40 = vadd.f32 %v2168_v6, %v299_v27  ;;  %v2332_v63 = vadd.f32 %v2172_v8, %v299_v27 }
 0x269   : > { %v460_v1 = vadd.f32 %v2323_v30, %v1932_v37  ;;  %v2338_v17 = vadd.f32 %v2326_v39, %v1956_v41  ;;  %v462_v5 = vadd.f32 %v2329_v40, %v1938_v38  ;;  %v463_v7 = vadd.f32 %v2332_v63, %v1962_v42  ;;  %878 = vrot.lane.b32.xlu1 %v2323_v30, %s1717_s5 }
 0x26a   : > { %884 = vrot.lane.b32.xlu0 %v2296_v32, %s1717_s5  ;;  %v1722_v37 = vmov 0.0  }
 0x26b   : > { %468 = vst [vmem:[%s2313_s6 + $0x20] sm:$0xff] %v460_v1  ;;  %469 = vst [vmem:[%s2313_s6 + $0x28] sm:$0xff] %v2338_v17  ;;  %v536_v38 = vsel %vm532_vm4, 1.0, %v1722_v37  ;;  %v642_v41 = vsel %vm3279_vm14, 1.0, %v1722_v37  ;;  %v537_v42 = vsel %vm3284_vm7, 1.0, %v1722_v37  ;;  %v535_v8 = vsel %vm531_vm1, 1.0, %v1722_v37 }
 0x26c   : > { %470 = vst [vmem:[%s2313_s6 + $0x30] sm:$0xff] %v462_v5  ;;  %471 = vst [vmem:[%s2313_s6 + $0x38] sm:$0xff] %v463_v7  ;;  %v540_v6 = vadd.f32 1.0, %v536_v38  ;;  %v548_v28 = vsel %vm544_vm6, 1.0, %v1722_v37  ;;  %v538_v36 = vsel %vm3281_vm9, 1.0, %v1722_v37  ;;  %v646_v43 = vadd.f32 1.0, %v642_v41 }
 0x26d   : > { %882 = vrot.lane.b32.xlu1 %v2326_v39, %s1717_s5  ;;  %v541_v22 = vadd.f32 1.0, %v537_v42  ;;  %v539_v48 = vadd.f32 1.0, %v535_v8  ;;  %v547_v49 = vsel %vm543_vm5, 1.0, %v1722_v37  ;;  %v654_v52 = vsel %vm3282_vm2, 1.0, %v1722_v37 }
 0x26e   : > { %888 = vrot.lane.b32.xlu0 %v2299_v26, %s1717_s5  ;;  %v552_v13 = vadd.f32 %v548_v28, %v540_v6  ;;  %v549_v53 = vsel %vm545_vm8, 1.0, %v1722_v37  ;;  %v643_v54 = vsel %vm3283_vm0, 1.0, %v1722_v37  ;;  %v752_v50 = vsel %vm748_vm13, 1.0, %v1722_v37 }
 0x26f   : > { %v542_v2 = vadd.f32 1.0, %v538_v36  ;;  %vm3301_vm14 = vcmp.ge.f32.partialorder %v1990_v16, 0.5  ;;  %vm760_vm9 = vcmp.le.f32.partialorder %v1980_v59, 6.5  ;;  %vm3302_vm2 = vcmp.le.f32.partialorder %v2039_v58, 6.5 }
 0x270   : > { %v641_v51 = vsel %vm3301_vm14, 1.0, %v1722_v37  ;;  %v550_v3 = vsel %vm3302_vm2, 1.0, %v1722_v37  ;;  %v644_v10 = vsel %vm640_vm3, 1.0, %v1722_v37  ;;  %v658_v21 = vadd.f32 %v654_v52, %v646_v43 }
 0x271   : > { %886 = vrot.lane.b32.xlu1 %v2329_v40, %s1717_s5  ;;  %vm3290_vm0 = vcmp.ge.f32.partialorder %v1978_v57, 0.5  ;;  %v553_v31 = vadd.f32 %v549_v53, %v541_v22  ;;  %v647_v19 = vadd.f32 1.0, %v643_v54  ;;  %v756_v11 = vadd.f32 1.0, %v752_v50 }
 0x272   : > { %900 = vrot.lane.b32.xlu0 %v2290_v14, %s1718_s20  ;;  %vm3289_vm7 = vcmp.ge.f32.partialorder %v1987_v4, 0.5  ;;  %v645_v23 = vadd.f32 1.0, %v641_v51  ;;  %v655_v15 = vsel %vm3285_vm10, 1.0, %v1722_v37  ;;  %v753_v60 = vsel %vm749_vm11, 1.0, %v1722_v37 }
 0x273   : > { %v764_v0 = vsel %vm760_vm9, 1.0, %v1722_v37  ;;  %v648_v27 = vadd.f32 1.0, %v644_v10  ;;  %v653_v1 = vsel %vm649_vm15, 1.0, %v1722_v37  ;;  %v751_v5 = vsel %vm3290_vm0, 1.0, %v1722_v37 }
 0x274   : > { %vm3288_vm2 = vcmp.le.f32.partialorder %v1983_v62, 6.5  ;;  %v662_v7 = vmul.f32 %v658_v21, %v552_v13  ;;  %v656_v38 = vsel %vm3286_vm12, 1.0, %v1722_v37  ;;  %vm759_vm14 = vcmp.le.f32.partialorder %v1978_v57, 6.5 }
 0x275   : > { %890 = vrot.lane.b32.xlu1 %v2332_v63, %s1717_s5  ;;  %v754_v41 = vsel %vm3289_vm7, 1.0, %v1722_v37  ;;  %v659_v42 = vadd.f32 %v655_v15, %v647_v19  ;;  %v757_v6 = vadd.f32 1.0, %v753_v60  ;;  %v768_v8 = vadd.f32 %v764_v0, %v756_v11 }
 0x276   : > { %904 = vrot.lane.b32.xlu0 %v2293_v25, %s1718_s20  ;;  %vm3287_vm10 = vcmp.le.f32.partialorder %v1987_v4, 6.5  ;;  %v551_v28 = vadd.f32 %v547_v49, %v539_v48  ;;  %v657_v36 = vadd.f32 %v653_v1, %v645_v23  ;;  %v755_v43 = vadd.f32 1.0, %v751_v5 }
 0x277   : > { %v765_v22 = vsel %vm3288_vm2, 1.0, %v1722_v37  ;;  %v554_v52 = vadd.f32 %v550_v3, %v542_v2  ;;  %v660_v13 = vadd.f32 %v656_v38, %v648_v27  ;;  %v763_v53 = vsel %vm759_vm14, 1.0, %v1722_v37 }
 0x278   : > { %v758_v54 = vadd.f32 1.0, %v754_v41  ;;  %v766_v50 = vsel %vm3287_vm10, 1.0, %v1722_v37  ;;  %v663_v51 = vmul.f32 %v659_v42, %v553_v31  ;;  %v772_v10 = vmul.f32 %v768_v8, %v662_v7 }
 0x279   : > { %902 = vrot.lane.b32.xlu1 %v2323_v30, %s1718_s20  ;;  %v769_v21 = vadd.f32 %v765_v22, %v757_v6  ;;  %v661_v19 = vmul.f32 %v657_v36, %v551_v28  ;;  %v767_v11 = vadd.f32 %v763_v53, %v755_v43  ;;  %v664_v48 = vmul.f32 %v660_v13, %v554_v52 }
 0x27a   : > { %908 = vrot.lane.b32.xlu0 %v2296_v32, %s1718_s20  ;;  %v770_v49 = vadd.f32 %v766_v50, %v758_v54  ;;  %1573 = vrcp.f32 %v772_v10  ;;  %vm791_vm12 = vcmp.lt.s32.totalorder %v1972_v44, 64 }
 0x27b   : > { %v773_v15 = vmul.f32 %v769_v21, %v663_v51  ;;  %v771_v60 = vmul.f32 %v767_v11, %v661_v19 }
 0x27c   : > { %v774_v2 = vmul.f32 %v770_v49, %v664_v48 }
 0x27d   : > { %906 = vrot.lane.b32.xlu1 %v2326_v39, %s1718_s20  ;;  %1575 = vrcp.f32 %v773_v15 }
 0x27e   : > { %912 = vrot.lane.b32.xlu0 %v2299_v26, %s1718_s20  ;;  %1577 = vrcp.f32 %v771_v60 }
 0x27f   : > { %1579 = vrcp.f32 %v774_v2 }
 0x281   : > { %910 = vrot.lane.b32.xlu1 %v2329_v40, %s1718_s20 }
 0x284   : > { %v2441_v7 = vpop.eup %1573 }
 0x285   : > { %914 = vrot.lane.b32.xlu1 %v2332_v63, %s1718_s20 }
 0x287   : > { %v2457_v13 = vpop.eup %1575 }
 0x288   : > { %v2465_v50 = vpop.eup %1577 }
 0x289   : > { %v2472_v48 = vpop.eup %1579 }
 0x2bd   : > { %v776_v23 = vpop.permute.xlu0 %775 }
 0x2c1   : > { %v780_v3 = vpop.permute.xlu0 %779 }
 0x2c2   : > { %v796_v0 = vsel %vm791_vm12, %v776_v23, %v780_v3 }
 0x2c3   : > { %v801_v37 = vsel %vm748_vm13, %v796_v0, 0.0  ;;  %v816_v49 = vsel %vm759_vm14, %v796_v0, 0.0 }
 0x2c4   : > { %v778_v31 = vpop.permute.xlu1 %777  ;;  %v809_v1 = vadd.f32 %v801_v37, %v2216_v9 }
 0x2c5   : > { %v784_v27 = vpop.permute.xlu0 %783 }
 0x2c6   : > { %v794_v5 = vsel %vm791_vm12, %v780_v3, %v784_v27 }
 0x2c7   : > { %v802_v38 = vsel %vm749_vm11, %v794_v5, 0.0  ;;  %v817_v41 = vsel %vm760_vm9, %v794_v5, 0.0 }
 0x2c8   : > { %v825_v42 = vadd.f32 %v817_v41, %v809_v1  ;;  %v782_v6 = vpop.permute.xlu1 %781  ;;  %v810_v8 = vadd.f32 %v802_v38, %v2242_v47 }
 0x2c9   : > { %v788_v28 = vpop.permute.xlu0 %787  ;;  %v797_v36 = vsel %vm791_vm12, %v778_v31, %v782_v6 }
 0x2ca   : > { %v837_v9 = vmul.f32 %v2441_v7, %v825_v42  ;;  %v792_v43 = vsel %vm791_vm12, %v784_v27, %v788_v28  ;;  %v798_v22 = vsel %vm791_vm12, %v788_v28, %v776_v23  ;;  %v805_v52 = vsel %vm748_vm13, %v797_v36, 0.0 }
 0x2cb   : > { %v800_v47 = vsel %vm3290_vm0, %v798_v22, 0.0  ;;  %v803_v53 = vsel %vm3289_vm7, %v792_v43, 0.0  ;;  %v818_v54 = vsel %vm3288_vm2, %v792_v43, 0.0  ;;  %v819_v23 = vsel %vm3287_vm10, %v798_v22, 0.0 }
 0x2cc   : > { %v2468_v51 = vadd.f32 %v837_v9, %v2293_v25  ;;  %v808_v10 = vadd.f32 %v800_v47, %v2197_v35  ;;  %v811_v21 = vadd.f32 %v803_v53, %v2262_v56  ;;  %v826_v19 = vadd.f32 %v818_v54, %v810_v8  ;;  %v786_v11 = vpop.permute.xlu1 %785 }
 0x2cd   : > { %v813_v15 = vadd.f32 %v805_v52, %v2260_v55  ;;  %v795_v60 = vsel %vm791_vm12, %v782_v6, %v786_v11  ;;  %v820_v22 = vsel %vm759_vm14, %v797_v36, 0.0 }
 0x2ce   : > { %861 = vst [vmem:[%s2313_s6 + $0x48] sm:$0xff] %v2468_v51  ;;  %v824_v35 = vadd.f32 %v816_v49, %v808_v10  ;;  %v827_v56 = vadd.f32 %v819_v23, %v811_v21  ;;  %v838_v2 = vmul.f32 %v2457_v13, %v826_v19  ;;  %v806_v3 = vsel %vm749_vm11, %v795_v60, 0.0 }
 0x2cf   : > { %v821_v0 = vsel %vm760_vm9, %v795_v60, 0.0  ;;  %v814_v38 = vadd.f32 %v806_v3, %v2277_v12 }
 0x2d0   : > { %v836_v37 = vmul.f32 %v2465_v50, %v824_v35  ;;  %v839_v55 = vmul.f32 %v2472_v48, %v827_v56  ;;  %v2491_v27 = vadd.f32 %v838_v2, %v2296_v32  ;;  %v829_v1 = vadd.f32 %v821_v0, %v813_v15  ;;  %v790_v5 = vpop.permute.xlu1 %789 }
 0x2d1   : > { %v793_v41 = vsel %vm791_vm12, %v786_v11, %v790_v5  ;;  %v799_v42 = vsel %vm791_vm12, %v790_v5, %v778_v31 }
 0x2d2   : > { %v2499_v6 = vadd.f32 %v836_v37, %v2290_v14  ;;  %v2502_v8 = vadd.f32 %v839_v55, %v2299_v26  ;;  %862 = vst [vmem:[%s2313_s6 + $0x50] sm:$0xff] %v2491_v27  ;;  %v841_v28 = vmul.f32 %v2441_v7, %v829_v1  ;;  %v804_v12 = vsel %vm3290_vm0, %v799_v42, 0.0 }
 0x2d3   : > { %v807_v9 = vsel %vm3289_vm7, %v793_v41, 0.0  ;;  %v812_v43 = vadd.f32 %v804_v12, %v2240_v46  ;;  %v822_v31 = vsel %vm3288_vm2, %v793_v41, 0.0  ;;  %v823_v46 = vsel %vm3287_vm10, %v799_v42, 0.0 }
 0x2d4   : > { %860 = vst [vmem:[%s2313_s6 + $0x40] sm:$0xff] %v2499_v6  ;;  %863 = vst [vmem:[%s2313_s6 + $0x58] sm:$0xff] %v2502_v8  ;;  %v2521_v52 = vadd.f32 %v841_v28, %v2326_v39  ;;  %v815_v47 = vadd.f32 %v807_v9, %v2284_v61  ;;  %v830_v53 = vadd.f32 %v822_v31, %v814_v38  ;;  %v877_v54 = vpop.permute.xlu0 %876  ;;  %1132 = vrot.lane.b32.xlu0 %v2499_v6, %s1717_s5 }
 0x2d5   : > { %v828_v10 = vadd.f32 %v820_v22, %v812_v43  ;;  %vm3303_vm10 = vcmp.lt.s32.totalorder %v1972_v44, 127  ;;  %vm3304_vm2 = vcmp.lt.s32.totalorder %v1972_v44, 1 }
 0x2d6   : > { %865 = vst [vmem:[%s2313_s6 + $0x68] sm:$0xff] %v2521_v52  ;;  %v831_v36 = vadd.f32 %v823_v46, %v815_v47  ;;  %v842_v21 = vmul.f32 %v2457_v13, %v830_v53  ;;  %vm3305_vm7 = vmmov %vm3303_vm10 }
 0x2d7   : > { %v840_v19 = vmul.f32 %v2465_v50, %v828_v10  ;;  %vm3307_vm0 = vmmov %vm3305_vm7 }
 0x2d8   : > { %v843_v61 = vmul.f32 %v2472_v48, %v831_v36  ;;  %v2534_v11 = vadd.f32 %v842_v21, %v2329_v40  ;;  %v881_v49 = vpop.permute.xlu0 %880  ;;  %1136 = vrot.lane.b32.xlu0 %v2468_v51, %s1717_s5 }
 0x2d9   : > { %v2539_v23 = vadd.f32 %v840_v19, %v2323_v30 }
 0x2da   : > { %v2542_v15 = vadd.f32 %v843_v61, %v2332_v63  ;;  %866 = vst [vmem:[%s2313_s6 + $0x70] sm:$0xff] %v2534_v11 }
 0x2db   : > { %864 = vst [vmem:[%s2313_s6 + $0x60] sm:$0xff] %v2539_v23  ;;  %v879_v60 = vpop.permute.xlu1 %878  ;;  %1134 = vrot.lane.b32.xlu1 %v2539_v23, %s1717_s5 }
 0x2dc   : > { %867 = vst [vmem:[%s2313_s6 + $0x78] sm:$0xff] %v2542_v15  ;;  %v885_v35 = vpop.permute.xlu0 %884  ;;  %1140 = vrot.lane.b32.xlu0 %v2491_v27, %s1717_s5 }
 0x2df   : > { %v883_v56 = vpop.permute.xlu1 %882  ;;  %1138 = vrot.lane.b32.xlu1 %v2521_v52, %s1717_s5 }
 0x2e0   : > { %v889_v2 = vpop.permute.xlu0 %888  ;;  %1144 = vrot.lane.b32.xlu0 %v2502_v8, %s1717_s5 }
 0x2e1   : > { %v898_v5 = vsel %vm3304_vm2, %v889_v2, %v877_v54 }
 0x2e2   : > { %v924_v28 = vsel %vm531_vm1, %v898_v5, -inf }
 0x2e3   : > { %v887_v3 = vpop.permute.xlu1 %886  ;;  %1142 = vrot.lane.b32.xlu1 %v2534_v11, %s1717_s5 }
 0x2e4   : > { %v901_v0 = vpop.permute.xlu0 %900  ;;  %1156 = vrot.lane.b32.xlu0 %v2499_v6, %s1718_s20 }
 0x2e7   : > { %v891_v37 = vpop.permute.xlu1 %890  ;;  %1146 = vrot.lane.b32.xlu1 %v2542_v15, %s1717_s5  ;;  %s1642_s5 = scalar_lea.vmem %s3218_s30, 4096 }
 0x2e8   : > { %v905_v55 = vpop.permute.xlu0 %904  ;;  %1160 = vrot.lane.b32.xlu0 %v2468_v51, %s1718_s20  ;;  %v899_v31 = vsel %vm3304_vm2, %v891_v37, %v879_v60  ;;  %p1643_p6 = scmp.ne.s32.totalorder %s3218_s30, %s1642_s5 }
 0x2e9   : > { %v920_v1 = vsel %vm3303_vm10, %v901_v0, %v905_v55  ;;  %vm3306_vm10 = vmmov %vm3304_vm2  ;;  %v928_v21 = vsel %vm531_vm1, %v899_v31, -inf }
 0x2ea   : > { %v932_v38 = vsel %vm543_vm5, %v920_v1, -inf  ;;  %v896_v9 = vsel %vm3306_vm10, %v877_v54, %v881_v49  ;;  %vm3309_vm10 = vmmov %vm3307_vm0  ;;  %p1644_p7 = pnand %p1643_p6, %p3405_p13 }
 0x2eb   : > { %v903_v41 = vpop.permute.xlu1 %902  ;;  %1158 = vrot.lane.b32.xlu1 %v2539_v23, %s1718_s20  ;;  %v940_v43 = vmax.f32 %v924_v28, %v932_v38  ;;  %v925_v54 = vsel %vm532_vm4, %v896_v9, -inf }
 0x2ec   : > { %v909_v42 = vpop.permute.xlu0 %908  ;;  %1164 = vrot.lane.b32.xlu0 %v2491_v27, %s1718_s20  ;;  %p1645_p5 = pneg %p1644_p7 }
 0x2ed   : > { %v918_v12 = vsel %vm3305_vm7, %v905_v55, %v909_v42  ;;  %vm3308_vm7 = vmmov %vm3304_vm2  ;;  %v2603_v55 = vmax.f32 %v2290_v14, %v940_v43 }
 0x2ee   : > { %v933_v22 = vsel %vm544_vm6, %v918_v12, -inf  ;;  %v894_v10 = vsel %vm3308_vm7, %v881_v49, %v885_v35 }
 0x2ef   : > { %v907_v47 = vpop.permute.xlu1 %906  ;;  %1162 = vrot.lane.b32.xlu1 %v2521_v52, %s1718_s20  ;;  %v941_v19 = vmax.f32 %v925_v54, %v933_v22 }
 0x2f0   : > { %v913_v53 = vpop.permute.xlu0 %912  ;;  %v921_v46 = vsel %vm3307_vm0, %v903_v41, %v907_v47  ;;  %1168 = vrot.lane.b32.xlu0 %v2502_v8, %s1718_s20  ;;  %vm3310_vm0 = vmmov %vm3304_vm2 }
 0x2f1   : > { %v916_v36 = vsel %vm3309_vm10, %v909_v42, %v913_v53  ;;  %v936_v61 = vsel %vm543_vm5, %v921_v46, -inf  ;;  %v897_v1 = vsel %vm3310_vm0, %v879_v60, %v883_v56  ;;  %vm3311_vm2 = vmmov %vm3309_vm10  ;;  %vm3313_vm10 = vcmp.ge.f32.partialorder %v2015_v45, 0.5 }
 0x2f2   : > { %v934_v5 = vsel %vm545_vm8, %v916_v36, -inf  ;;  %v922_v38 = vsel %vm3311_vm2, %v913_v53, %v901_v0  ;;  %vm3312_vm7 = vmmov %vm3311_vm2  ;;  %v926_v14 = vsel %vm3313_vm10, %v894_v10, -inf  ;;  %v892_v60 = vsel %vm3310_vm0, %v885_v35, %v889_v2 }
 0x2f3   : > { %v911_v49 = vpop.permute.xlu1 %910  ;;  %1166 = vrot.lane.b32.xlu1 %v2534_v11, %s1718_s20  ;;  %v944_v28 = vmax.f32 %v928_v21, %v936_v61  ;;  %v929_v12 = vsel %vm532_vm4, %v897_v1, -inf  ;;  %v942_v9 = vmax.f32 %v926_v14, %v934_v5  ;;  %v2626_v43 = vmax.f32 %v2293_v25, %v941_v19  ;;  %vm3314_vm2 = vmmov %vm3310_vm0 }
 0x2f4   : > { %v919_v42 = vsel %vm3312_vm7, %v907_v47, %v911_v49  ;;  %956 = vrot.lane.b32.xlu0 %v2603_v55, %s1719_s22  ;;  %v895_v31 = vsel %vm3314_vm2, %v883_v56, %v887_v3  ;;  %vm3315_vm7 = vcmp.le.f32.partialorder %v2039_v58, 6.5  ;;  %vm3316_vm10 = vcmp.lt.s32.totalorder %v1972_v44, 127 }
 0x2f5   : > { %v937_v0 = vsel %vm544_vm6, %v919_v42, -inf  ;;  %v935_v22 = vsel %vm3315_vm7, %v922_v38, -inf  ;;  %vm3317_vm0 = vcmp.ge.f32.partialorder %v2039_v58, 0.5  ;;  %v2641_v53 = vmax.f32 %v2323_v30, %v944_v28 }
 0x2f6   : > { %v927_v25 = vsel %vm3317_vm0, %v892_v60, -inf  ;;  %v945_v2 = vmax.f32 %v929_v12, %v937_v0  ;;  %vm3318_vm2 = vcmp.ge.f32.partialorder %v2015_v45, 0.5  ;;  %v2648_v10 = vmax.f32 %v2296_v32, %v942_v9 }
 0x2f7   : > { %v915_v47 = vpop.permute.xlu1 %914  ;;  %1170 = vrot.lane.b32.xlu1 %v2542_v15, %s1718_s20  ;;  %v930_v56 = vsel %vm3318_vm2, %v895_v31, -inf  ;;  %v943_v46 = vmax.f32 %v927_v25, %v935_v22  ;;  %vm3319_vm7 = vcmp.lt.s32.totalorder %v1972_v44, 1  ;;  %vm3320_vm2 = vcmp.le.f32.partialorder %v2039_v58, 6.5  ;;  %s1723_s20 = smov [#allocation8]  }
 0x2f8   : > { %v917_v35 = vsel %vm3316_vm10, %v911_v49, %v915_v47  ;;  %960 = vrot.lane.b32.xlu0 %v2626_v43, %s1719_s22  ;;  %v893_v36 = vsel %vm3319_vm7, %v887_v3, %v891_v37  ;;  %v923_v21 = vsel %vm3316_vm10, %v915_v47, %v903_v41  ;;  %v2659_v19 = vmax.f32 %v2326_v39, %v945_v2  ;;  %vm3321_vm10 = vmmov %vm3319_vm7 }
 0x2f9   : > { %v938_v54 = vsel %vm545_vm8, %v917_v35, -inf  ;;  %v931_v32 = vsel %vm3317_vm0, %v893_v36, -inf  ;;  %v939_v61 = vsel %vm3320_vm2, %v923_v21, -inf  ;;  %v2666_v3 = vmax.f32 %v2299_v26, %v943_v46  ;;  %vm3323_vm2 = vmmov %vm3319_vm7 }
 0x2fa   : > { %v946_v30 = vmax.f32 %v930_v56, %v938_v54  ;;  %v947_v37 = vmax.f32 %v931_v32, %v939_v61  ;;  %vm3322_vm0 = vcmp.lt.s32.totalorder %v1972_v44, 127 }
 0x2fb   : > { %958 = vrot.lane.b32.xlu1 %v2641_v53, %s1719_s22 }
 0x2fc   : > { %964 = vrot.lane.b32.xlu0 %v2648_v10, %s1719_s22  ;;  %v2673_v41 = vmax.f32 %v2329_v40, %v946_v30  ;;  %v2680_v39 = vmax.f32 %v2332_v63, %v947_v37 }
 0x2ff   : > { %962 = vrot.lane.b32.xlu1 %v2659_v19, %s1719_s22 }
 0x300   : > { %968 = vrot.lane.b32.xlu0 %v2666_v3, %s1719_s22 }
 0x303   : > { %966 = vrot.lane.b32.xlu1 %v2673_v41, %s1719_s22 }
 0x304   : > { %980 = vrot.lane.b32.xlu0 %v2603_v55, %s1720_s10 }
 0x307   : > { %970 = vrot.lane.b32.xlu1 %v2680_v39, %s1719_s22 }
 0x308   : > { %984 = vrot.lane.b32.xlu0 %v2626_v43, %s1720_s10 }
 0x30b   : > { %982 = vrot.lane.b32.xlu1 %v2641_v53, %s1720_s10 }
 0x30c   : > { %988 = vrot.lane.b32.xlu0 %v2648_v10, %s1720_s10 }
 0x30f   : > { %986 = vrot.lane.b32.xlu1 %v2659_v19, %s1720_s10 }
 0x310   : > { %992 = vrot.lane.b32.xlu0 %v2666_v3, %s1720_s10 }
 0x313   : > { %990 = vrot.lane.b32.xlu1 %v2673_v41, %s1720_s10 }
 0x317   : > { %994 = vrot.lane.b32.xlu1 %v2680_v39, %s1720_s10 }
 0x346   : > { %v1133_v26 = vpop.permute.xlu0 %1132 }
 0x34a   : > { %v1137_v40 = vpop.permute.xlu0 %1136 }
 0x34b   : > { %v1152_v28 = vsel %vm3321_vm10, %v1133_v26, %v1137_v40  ;;  %vm3325_vm10 = vcmp.ge.f32.partialorder %v2015_v45, 0.5 }
 0x34c   : > { %v1181_v22 = vsel %vm532_vm4, %v1152_v28, 0.0 }
 0x34d   : > { %v1135_v63 = vpop.permute.xlu1 %1134 }
 0x34e   : > { %v1141_v1 = vpop.permute.xlu0 %1140 }
 0x34f   : > { %v1150_v47 = vsel %vm3323_vm2, %v1137_v40, %v1141_v1 }
 0x350   : > { %v1182_v54 = vsel %vm3325_vm10, %v1150_v47, 0.0  ;;  %vm3328_vm10 = vmmov %vm3322_vm0 }
 0x351   : > { %v1139_v5 = vpop.permute.xlu1 %1138 }
 0x352   : > { %v1145_v49 = vpop.permute.xlu0 %1144  ;;  %v1153_v30 = vsel %vm3323_vm2, %v1135_v63, %v1139_v5 }
 0x353   : > { %v1154_v38 = vsel %vm3319_vm7, %v1145_v49, %v1133_v26  ;;  %vm3324_vm7 = vmmov %vm3323_vm2  ;;  %v1190_v26 = vadd.f32 %v1182_v54, %v2491_v27 }
 0x354   : > { %v1180_v60 = vsel %vm531_vm1, %v1154_v38, 0.0 }
 0x355   : > { %v1143_v42 = vpop.permute.xlu1 %1142  ;;  %v1188_v0 = vadd.f32 %v1180_v60, %v2499_v6  ;;  %v1189_v6 = vadd.f32 %v1181_v22, %v2468_v51 }
 0x356   : > { %v1157_v14 = vpop.permute.xlu0 %1156 }
 0x359   : > { %v1147_v12 = vpop.permute.xlu1 %1146 }
 0x35a   : > { %v1161_v9 = vpop.permute.xlu0 %1160  ;;  %v1155_v25 = vsel %vm3324_vm7, %v1147_v12, %v1135_v63  ;;  %vm3326_vm7 = vmmov %vm3323_vm2  ;;  %v1185_v63 = vsel %vm532_vm4, %v1153_v30, 0.0  ;;  %vm3329_vm2 = vcmp.ge.f32.partialorder %v2039_v58, 0.5  ;;  %vm3330_vm4 = vcmp.le.f32.partialorder %v2039_v58, 6.5 }
 0x35b   : > { %v1176_v31 = vsel %vm3322_vm0, %v1157_v14, %v1161_v9  ;;  %v1184_v36 = vsel %vm531_vm1, %v1155_v25, 0.0  ;;  %v1148_v51 = vsel %vm3326_vm7, %v1141_v1, %v1145_v49  ;;  %vm3327_vm1 = vmmov %vm3322_vm0  ;;  %v1193_v29 = vadd.f32 %v1185_v63, %v2521_v52 }
 0x35c   : > { %v1196_v35 = vsel %vm543_vm5, %v1176_v31, 0.0  ;;  %v1192_v40 = vadd.f32 %v1184_v36, %v2539_v23  ;;  %v1183_v27 = vsel %vm3329_vm2, %v1148_v51, 0.0  ;;  %v1151_v23 = vsel %vm3326_vm7, %v1139_v5, %v1143_v42  ;;  %vm3334_vm2 = vmmov %vm3322_vm0 }
 0x35d   : > { %v2715_v2 = vadd.f32 %v1196_v35, %v1188_v0  ;;  %v1159_v56 = vpop.permute.xlu1 %1158  ;;  %v1191_v5 = vadd.f32 %v1183_v27, %v2502_v8 }
 0x35e   : > { %v1165_v46 = vpop.permute.xlu0 %1164 }
 0x35f   : > { %v1174_v21 = vsel %vm3322_vm0, %v1161_v9, %v1165_v46  ;;  %1212 = vrot.lane.b32.xlu0 %v2715_v2, %s1719_s22 }
 0x360   : > { %v1197_v32 = vsel %vm544_vm6, %v1174_v21, 0.0 }
 0x361   : > { %v2732_v61 = vadd.f32 %v1197_v32, %v1189_v6  ;;  %v1163_v37 = vpop.permute.xlu1 %1162 }
 0x362   : > { %v1169_v38 = vpop.permute.xlu0 %1168  ;;  %v1177_v60 = vsel %vm3327_vm1, %v1159_v56, %v1163_v37  ;;  %vm3332_vm1 = vcmp.ge.f32.partialorder %v2015_v45, 0.5 }
 0x363   : > { %v1172_v28 = vsel %vm3328_vm10, %v1165_v46, %v1169_v38  ;;  %v1178_v1 = vsel %vm3322_vm0, %v1169_v38, %v1157_v14  ;;  %v1200_v49 = vsel %vm543_vm5, %v1177_v60, 0.0  ;;  %1216 = vrot.lane.b32.xlu0 %v2732_v61, %s1719_s22  ;;  %vm3331_vm5 = vmmov %vm3322_vm0  ;;  %v1186_v25 = vsel %vm3332_vm1, %v1151_v23, 0.0 }
 0x364   : > { %v1198_v9 = vsel %vm545_vm8, %v1172_v28, 0.0  ;;  %v2754_v0 = vadd.f32 %v1200_v49, %v1192_v40  ;;  %v1199_v22 = vsel %vm3330_vm4, %v1178_v1, 0.0  ;;  %vm3333_vm10 = vmmov %vm3326_vm7  ;;  %v1194_v21 = vadd.f32 %v1186_v25, %v2534_v11 }
 0x365   : > { %v2756_v31 = vadd.f32 %v1198_v9, %v1190_v26  ;;  %v1167_v14 = vpop.permute.xlu1 %1166  ;;  %v1149_v52 = vsel %vm3333_vm10, %v1143_v42, %v1147_v12  ;;  %v2776_v54 = vadd.f32 %v1199_v22, %v1191_v5  ;;  %vm3336_vm7 = vmmov %vm3330_vm4  ;;  %vm3340_vm1 = vcmp.lt.s32.totalorder %v1972_v44, 120 }
 0x366   : > { %v957_v47 = vpop.permute.xlu0 %956  ;;  %v1175_v35 = vsel %vm3331_vm5, %v1163_v37, %v1167_v14  ;;  %1214 = vrot.lane.b32.xlu1 %v2754_v0, %s1719_s22  ;;  %vm3341_vm10 = vcmp.ge.f32.partialorder %v1990_v16, 0.5 }
 0x367   : > { %v1201_v46 = vsel %vm544_vm6, %v1175_v35, 0.0  ;;  %1220 = vrot.lane.b32.xlu0 %v2756_v31, %s1719_s22  ;;  %vm3335_vm6 = vcmp.ge.f32.partialorder %v2039_v58, 0.5 }
 0x368   : > { %v2774_v6 = vadd.f32 %v1201_v46, %v1193_v29  ;;  %v1187_v42 = vsel %vm3335_vm6, %v1149_v52, 0.0 }
 0x369   : > { %v1171_v36 = vpop.permute.xlu1 %1170 }
 0x36a   : > { %v961_v8 = vpop.permute.xlu0 %960  ;;  %v1173_v30 = vsel %vm3322_vm0, %v1167_v14, %v1171_v36  ;;  %v1179_v33 = vsel %vm3334_vm2, %v1171_v36, %v1159_v56  ;;  %1218 = vrot.lane.b32.xlu1 %v2774_v6, %s1719_s22  ;;  %v1195_v56 = vadd.f32 %v1187_v42, %v2542_v15 }
 0x36b   : > { %v1202_v12 = vsel %vm545_vm8, %v1173_v30, 0.0  ;;  %1224 = vrot.lane.b32.xlu0 %v2776_v54, %s1719_s22  ;;  %v1203_v32 = vsel %vm3336_vm7, %v1179_v33, 0.0  ;;  %vm3337_vm8 = vcmp.lt.s32.totalorder %v1972_v44, 8  ;;  %vm3345_vm7 = vmmov %vm3340_vm1 }
 0x36c   : > { %v2791_v11 = vadd.f32 %v1202_v12, %v1194_v21  ;;  %v2800_v45 = vadd.f32 %v1203_v32, %v1195_v56  ;;  %vm3338_vm4 = vmmov %vm3337_vm8 }
 0x36d   : > { %v959_v51 = vpop.permute.xlu1 %958  ;;  %vm3339_vm5 = vmmov %vm3338_vm4 }
 0x36e   : > { %v965_v37 = vpop.permute.xlu0 %964  ;;  %1222 = vrot.lane.b32.xlu1 %v2791_v11, %s1719_s22  ;;  %vm3342_vm0 = vmmov %vm3338_vm4 }
 0x36f   : > { %1236 = vrot.lane.b32.xlu0 %v2715_v2, %s1720_s10  ;;  %v976_v9 = vsel %vm3342_vm0, %v957_v47, %v961_v8  ;;  %vm3343_vm2 = vmmov %vm3342_vm0 }
 0x370   : > { %v974_v35 = vsel %vm3343_vm2, %v961_v8, %v965_v37  ;;  %vm3344_vm6 = vmmov %vm3342_vm0 }
 0x371   : > { %v963_v26 = vpop.permute.xlu1 %962 }
 0x372   : > { %v969_v40 = vpop.permute.xlu0 %968  ;;  %1226 = vrot.lane.b32.xlu1 %v2800_v45, %s1719_s22  ;;  %s1646_s22 = sshll.u32 %s1723_s20, 4  ;;  %s1647_s22 = int_to_ptr.vmem [resolvable:$false] %s1646_s22 }
 0x373   : > { %v972_v58 = vsel %vm3337_vm8, %v965_v37, %v969_v40  ;;  %1240 = vrot.lane.b32.xlu0 %v2732_v61, %s1720_s10  ;;  %v978_v60 = vsel %vm3338_vm4, %v969_v40, %v957_v47  ;;  %vm3346_vm8 = vcmp.ge.f32.partialorder %v1996_v20, 0.5  ;;  %vm3347_vm4 = vcmp.le.f32.partialorder %v1996_v20, 6.5  ;;  %p1649_p8 = scmp.lt.s32.totalorder %s3218_s30, %s1647_s22 }
 0x374   : > { %v1004_v27 = vsel %vm3341_vm10, %v978_v60, -inf  ;;  %v1005_v47 = vsel %vm3346_vm8, %v976_v9, -inf  ;;  %v2866_v37 = vsel %vm640_vm3, %v972_v58, -inf  ;;  %vm3354_vm8 = vcmp.le.f32.partialorder %v2009_v34, 6.5 }
 0x375   : > { %v967_v15 = vpop.permute.xlu1 %966 }
 0x376   : > { %v981_v38 = vpop.permute.xlu0 %980  ;;  %1238 = vrot.lane.b32.xlu1 %v2754_v0, %s1720_s10 }
 0x377   : > { %1244 = vrot.lane.b32.xlu0 %v2756_v31, %s1720_s10 }
 0x379   : > { %v971_v63 = vpop.permute.xlu1 %970 }
 0x37a   : > { %v985_v28 = vpop.permute.xlu0 %984  ;;  %v973_v1 = vsel %vm3339_vm5, %v967_v15, %v971_v63  ;;  %1242 = vrot.lane.b32.xlu1 %v2774_v6, %s1720_s10  ;;  %v979_v25 = vsel %vm3344_vm6, %v971_v63, %v959_v51  ;;  %vm3348_vm5 = vcmp.ge.f32.partialorder %v1999_v24, 0.5 }
 0x37b   : > { %v1000_v49 = vsel %vm3340_vm1, %v981_v38, %v985_v28  ;;  %1248 = vrot.lane.b32.xlu0 %v2776_v54, %s1720_s10  ;;  %vm3349_vm1 = vmmov %vm3342_vm0  ;;  %v1008_v30 = vsel %vm3341_vm10, %v979_v25, -inf  ;;  %vm3358_vm10 = vcmp.lt.s32.totalorder %v1972_v44, 8 }
 0x37c   : > { %v1012_v23 = vsel %vm649_vm15, %v1000_v49, -inf  ;;  %v977_v8 = vsel %vm3349_vm1, %v959_v51, %v963_v26  ;;  %vm3350_vm0 = vmmov %vm3345_vm7  ;;  %vm3357_vm1 = vcmp.le.f32.partialorder %v1996_v20, 6.5 }
 0x37d   : > { %v1020_v14 = vmax.f32 %v1004_v27, %v1012_v23  ;;  %v983_v29 = vpop.permute.xlu1 %982  ;;  %vm3351_vm2 = vmmov %vm3350_vm0 }
 0x37e   : > { %v989_v22 = vpop.permute.xlu0 %988  ;;  %1246 = vrot.lane.b32.xlu1 %v2791_v11, %s1720_s10  ;;  %vm3352_vm6 = vmmov %vm3350_vm0 }
 0x37f   : > { %v2833_v5 = vmax.f32 %v2603_v55, %v1020_v14  ;;  %v998_v46 = vsel %vm3345_vm7, %v985_v28, %v989_v22  ;;  %v1006_v55 = vsel %vm3348_vm5, %v974_v35, -inf  ;;  %vm3353_vm7 = vcmp.le.f32.partialorder %v1999_v24, 6.5 }
 0x380   : > { %v1013_v52 = vsel %vm3347_vm4, %v998_v46, -inf  ;;  %vm3355_vm4 = vmmov %vm3350_vm0  ;;  %vm3356_vm5 = vcmp.ge.f32.partialorder %v1996_v20, 0.5  ;;  %v975_v14 = vsel %vm3358_vm10, %v963_v26, %v967_v15  ;;  %v2907_v15 = vsel %vm640_vm3, %v973_v1, -inf }
 0x381   : > { %v1021_v36 = vmax.f32 %v1005_v47, %v1013_v52  ;;  %1036 = vrot.lane.b32.xlu0 %v2833_v5, %s1721_s26  ;;  %v987_v21 = vpop.permute.xlu1 %986  ;;  %v1009_v27 = vsel %vm3356_vm5, %v977_v8, -inf  ;;  %vm3362_vm5 = vcmp.ge.f32.partialorder %v1990_v16, 0.5 }
 0x382   : > { %v993_v33 = vpop.permute.xlu0 %992  ;;  %v1001_v42 = vsel %vm3350_vm0, %v983_v29, %v987_v21  ;;  %1250 = vrot.lane.b32.xlu1 %v2800_v45, %s1720_s10  ;;  %s1648_s10 = scalar_lea.vmem %s1647_s22, 8192 }
 0x383   : > { %v2856_v12 = vmax.f32 %v2626_v43, %v1021_v36  ;;  %v996_v32 = vsel %vm3351_vm2, %v989_v22, %v993_v33  ;;  %v1002_v56 = vsel %vm3352_vm6, %v993_v33, %v981_v38  ;;  %v1016_v51 = vsel %vm649_vm15, %v1001_v42, -inf  ;;  %vm3359_vm2 = vmmov %vm3350_vm0  ;;  %p1650_p9 = scmp.lt.s32.totalorder %s1648_s10, %s1642_s5 }
 0x384   : > { %v1014_v40 = vsel %vm3353_vm7, %v996_v32, -inf  ;;  %v2872_v43 = vsel %vm3354_vm8, %v1002_v56, -inf  ;;  %v1024_v60 = vmax.f32 %v1008_v30, %v1016_v51  ;;  %vm3360_vm6 = vcmp.ge.f32.partialorder %v1999_v24, 0.5 }
 0x385   : > { %v1022_v63 = vmax.f32 %v1006_v55, %v1014_v40  ;;  %v1023_v28 = vmax.f32 %v2866_v37, %v2872_v43  ;;  %1040 = vrot.lane.b32.xlu0 %v2856_v12, %s1721_s26  ;;  %v991_v38 = vpop.permute.xlu1 %990  ;;  %v1010_v26 = vsel %vm3360_vm6, %v975_v14, -inf  ;;  %p1651_p0 = por %p1650_p9, %p1649_p8 }
 0x386   : > { %v2879_v49 = vmax.f32 %v2641_v53, %v1024_v60  ;;  %v999_v58 = vsel %vm3355_vm4, %v987_v21, %v991_v38  ;;  %vm3361_vm4 = vmmov %vm3358_vm10 }
 0x387   : > { %v2886_v23 = vmax.f32 %v2648_v10, %v1022_v63  ;;  %v1017_v9 = vsel %vm3357_vm1, %v999_v58, -inf  ;;  %vm3363_vm1 = vmmov %vm3361_vm4  ;;  %p1652_p1 = pnand %p1651_p0, %p1645_p5 }
 0x388   : > { %v1025_v22 = vmax.f32 %v1009_v27, %v1017_v9  ;;  %1038 = vrot.lane.b32.xlu1 %v2879_v49, %s1721_s26  ;;  %vm3364_vm10 = vmmov %vm3350_vm0 }
 0x389   : > { %1044 = vrot.lane.b32.xlu0 %v2886_v23, %s1721_s26  ;;  %v995_v53 = vpop.permute.xlu1 %994  ;;  %vm3367_vm6 = vmmov %vm3363_vm1 }
 0x38a   : > { %v2897_v35 = vmax.f32 %v2659_v19, %v1025_v22  ;;  %v997_v10 = vsel %vm3350_vm0, %v991_v38, %v995_v53  ;;  %v1003_v25 = vsel %vm3359_vm2, %v995_v53, %v983_v29  ;;  %vm3365_vm0 = vcmp.ge.f32.partialorder %v1996_v20, 0.5  ;;  %vm3366_vm2 = vmmov %vm3363_vm1 }
 0x38b   : > { %v1018_v46 = vsel %vm3353_vm7, %v997_v10, -inf  ;;  %v2913_v19 = vsel %vm3354_vm8, %v1003_v25, -inf  ;;  %vm3368_vm7 = vcmp.ge.f32.partialorder %v1999_v24, 0.5  ;;  %vm3369_vm8 = vmmov %vm3362_vm5 }
 0x38c   : > { %v1026_v47 = vmax.f32 %v1010_v26, %v1018_v46  ;;  %v1027_v52 = vmax.f32 %v2907_v15, %v2913_v19  ;;  %1042 = vrot.lane.b32.xlu1 %v2897_v35, %s1721_s26 }
 0x38e   : > { %v2920_v29 = vmax.f32 %v2673_v41, %v1026_v47 }
 0x390   : > { %1046 = vrot.lane.b32.xlu1 %v2920_v29, %s1721_s26 }
 0x3d1   : > { %v1213_v1 = vpop.permute.xlu0 %1212 }
 0x3d5   : > { %v1217_v36 = vpop.permute.xlu0 %1216 }
 0x3d6   : > { %v1232_v41 = vsel %vm3363_vm1, %v1213_v1, %v1217_v36 }
 0x3d7   : > { %v1261_v38 = vsel %vm3365_vm0, %v1232_v41, 0.0 }
 0x3d8   : > { %v1215_v21 = vpop.permute.xlu1 %1214 }
 0x3d9   : > { %v1221_v55 = vpop.permute.xlu0 %1220 }
 0x3da   : > { %v1230_v58 = vsel %vm3366_vm2, %v1217_v36, %v1221_v55 }
 0x3db   : > { %v1262_v10 = vsel %vm3368_vm7, %v1230_v58, 0.0 }
 0x3dc   : > { %v1219_v8 = vpop.permute.xlu1 %1218 }
 0x3dd   : > { %v1225_v30 = vpop.permute.xlu0 %1224 }
 0x3de   : > { %v1234_v33 = vsel %vm3361_vm4, %v1225_v30, %v1213_v1  ;;  %vm3370_vm4 = vmmov %vm3364_vm10 }
 0x3df   : > { %v1260_v56 = vsel %vm3362_vm5, %v1234_v33, 0.0  ;;  %vm3371_vm5 = vmmov %vm3363_vm1  ;;  %vm3372_vm1 = vcmp.le.f32.partialorder %v1996_v20, 6.5  ;;  %v1270_v33 = vadd.f32 %v1262_v10, %v2756_v31 }
 0x3e0   : > { %v1223_v42 = vpop.permute.xlu1 %1222  ;;  %v1268_v60 = vadd.f32 %v1260_v56, %v2715_v2  ;;  %v1269_v2 = vadd.f32 %v1261_v38, %v2732_v61  ;;  %v1233_v46 = vsel %vm3371_vm5, %v1215_v21, %v1219_v8  ;;  %vm3374_vm0 = vmmov %vm3370_vm4 }
 0x3e1   : > { %v1237_v32 = vpop.permute.xlu0 %1236  ;;  %vm3377_vm7 = vmmov %vm3374_vm0 }
 0x3e4   : > { %v1227_v51 = vpop.permute.xlu1 %1226 }
 0x3e5   : > { %v1241_v40 = vpop.permute.xlu0 %1240  ;;  %v1235_v9 = vsel %vm3367_vm6, %v1227_v51, %v1215_v21  ;;  %vm3376_vm6 = vmmov %vm3374_vm0 }
 0x3e6   : > { %v1256_v63 = vsel %vm3364_vm10, %v1237_v32, %v1241_v40  ;;  %v1264_v25 = vsel %vm3369_vm8, %v1235_v9, 0.0  ;;  %vm3373_vm10 = vmmov %vm3366_vm2  ;;  %vm3375_vm2 = vcmp.ge.f32.partialorder %v1996_v20, 0.5 }
 0x3e7   : > { %v1276_v27 = vsel %vm649_vm15, %v1256_v63, 0.0  ;;  %v1228_v61 = vsel %vm3373_vm10, %v1221_v55, %v1225_v30  ;;  %v1272_v56 = vadd.f32 %v1264_v25, %v2754_v0  ;;  %v1265_v21 = vsel %vm3375_vm2, %v1233_v46, 0.0  ;;  %vm3378_vm8 = vmmov %vm3371_vm5 }
 0x3e8   : > { %v2941_v14 = vadd.f32 %v1276_v27, %v1268_v60  ;;  %v1239_v22 = vpop.permute.xlu1 %1238  ;;  %v1263_v0 = vsel %vm640_vm3, %v1228_v61, 0.0  ;;  %v1231_v31 = vsel %vm3378_vm8, %v1219_v8, %v1223_v42  ;;  %v1273_v16 = vadd.f32 %v1265_v21, %v2774_v6  ;;  %vm3381_vm5 = vmmov %vm3374_vm0 }
 0x3e9   : > { %v1245_v53 = vpop.permute.xlu0 %1244  ;;  %v1271_v8 = vadd.f32 %v1263_v0, %v2776_v54  ;;  %vm3383_vm10 = vcmp.le.f32.partialorder %v1996_v20, 6.5  ;;  %vm3385_vm2 = vmmov %vm3381_vm5 }
 0x3ea   : > { %v1254_v26 = vsel %vm3370_vm4, %v1241_v40, %v1245_v53  ;;  %1292 = vrot.lane.b32.xlu0 %v2941_v14, %s1721_s26  ;;  %vm3379_vm4 = vcmp.le.f32.partialorder %v1999_v24, 6.5 }
 0x3eb   : > { %v1277_v47 = vsel %vm3372_vm1, %v1254_v26, 0.0  ;;  %vm3382_vm1 = vcmp.ge.f32.partialorder %v1999_v24, 0.5 }
 0x3ec   : > { %v2958_v1 = vadd.f32 %v1277_v47, %v1269_v2  ;;  %v1243_v36 = vpop.permute.xlu1 %1242 }
 0x3ed   : > { %v1249_v41 = vpop.permute.xlu0 %1248  ;;  %v1257_v40 = vsel %vm3374_vm0, %v1239_v22, %v1243_v36  ;;  %vm3384_vm0 = vmmov %vm3378_vm8 }
 0x3ee   : > { %v1252_v60 = vsel %vm3376_vm6, %v1245_v53, %v1249_v41  ;;  %v1258_v55 = vsel %vm3377_vm7, %v1249_v41, %v1237_v32  ;;  %v1280_v30 = vsel %vm649_vm15, %v1257_v40, 0.0  ;;  %1296 = vrot.lane.b32.xlu0 %v2958_v1, %s1721_s26  ;;  %vm3380_vm15 = vcmp.le.f32.partialorder %v2009_v34, 6.5  ;;  %vm3386_vm6 = vmmov %vm3385_vm2 }
 0x3ef   : > { %v1278_v63 = vsel %vm3379_vm4, %v1252_v60, 0.0  ;;  %v2980_v38 = vadd.f32 %v1280_v30, %v1272_v56  ;;  %v1279_v27 = vsel %vm3380_vm15, %v1258_v55, 0.0  ;;  %v1266_v53 = vsel %vm3382_vm1, %v1231_v31, 0.0  ;;  %vm3387_vm7 = vmmov %vm3379_vm4 }
 0x3f0   : > { %v2982_v58 = vadd.f32 %v1278_v63, %v1270_v33  ;;  %v1247_v32 = vpop.permute.xlu1 %1246  ;;  %v1229_v6 = vsel %vm3384_vm0, %v1223_v42, %v1227_v51  ;;  %v3004_v26 = vadd.f32 %v1279_v27, %v1271_v8  ;;  %v1274_v54 = vadd.f32 %v1266_v53, %v2791_v11  ;;  %vm3388_vm8 = vmmov %vm3380_vm15 }
 0x3f1   : > { %v1255_v9 = vsel %vm3381_vm5, %v1243_v36, %v1247_v32  ;;  %1294 = vrot.lane.b32.xlu1 %v2980_v38, %s1721_s26  ;;  %v1267_v42 = vsel %vm640_vm3, %v1229_v6, 0.0  ;;  %v3056_v40 = vmax.f32 %v2680_v39, %v1027_v52  ;;  %vm3389_vm3 = vcmp.ge.f32.partialorder %v1978_v57, 0.5 }
 0x3f2   : > { %v1281_v2 = vsel %vm3383_vm10, %v1255_v9, 0.0  ;;  %1300 = vrot.lane.b32.xlu0 %v2982_v58, %s1721_s26  ;;  %v1275_v33 = vadd.f32 %v1267_v42, %v2800_v45  ;;  %vm3390_vm4 = vcmp.ge.f32.partialorder %v1987_v4, 0.5  ;;  %vm3391_vm15 = vcmp.le.f32.partialorder %v1983_v62, 6.5  ;;  %vm3395_vm1 = vmmov %vm3389_vm3  ;;  %v1120_v62 = vld [vmem:[%s2313_s6 + $0x20] sm:$0xff] }
 0x3f3   : > { %v3000_v10 = vadd.f32 %v1281_v2, %v1273_v16  ;;  %v3002_v25 = vpop.permute.xlu0 %1036  ;;  %vm3394_vm5 = vmmov %vm3391_vm15 }
 0x3f4   : > { %v1251_v46 = vpop.permute.xlu1 %1250  ;;  %vm3399_vm0 = vmmov %vm3395_vm1 }
 0x3f5   : > { %v1253_v47 = vsel %vm3385_vm2, %v1247_v32, %v1251_v46  ;;  %v1259_v20 = vsel %vm3386_vm6, %v1251_v46, %v1239_v22  ;;  %1298 = vrot.lane.b32.xlu1 %v3000_v10, %s1721_s26  ;;  %v3025_v22 = vmax.f32 %v2666_v3, %v1023_v28  ;;  %vm3401_vm6 = vmmov %vm3399_vm0 }
 0x3f6   : > { %v1282_v51 = vsel %vm3387_vm7, %v1253_v47, 0.0  ;;  %1304 = vrot.lane.b32.xlu0 %v3004_v26, %s1721_s26  ;;  %v1283_v36 = vsel %vm3388_vm8, %v1259_v20, 0.0  ;;  %vm3402_vm7 = vmmov %vm3390_vm4 }
 0x3f7   : > { %v3019_v61 = vadd.f32 %v1282_v51, %v1274_v54  ;;  %v1041_v11 = vpop.permute.xlu0 %1040  ;;  %v3039_v3 = vadd.f32 %v1283_v36, %v1275_v33  ;;  %vm3403_vm8 = vmmov %vm3394_vm5 }
 0x3f8   : > { %v1056_v24 = vsel %vm791_vm12, %v3002_v25, %v1041_v11 }
 0x3f9   : > { %1302 = vrot.lane.b32.xlu1 %v3019_v61, %s1721_s26  ;;  %v1061_v45 = vsel %vm748_vm13, %v1056_v24, -inf  ;;  %v1068_v53 = vsel %vm759_vm14, %v1056_v24, -inf }
 0x3fa   : > { %1048 = vrot.lane.b32.xlu0 %v3025_v22, %s1721_s26  ;;  %v3037_v56 = vpop.permute.xlu1 %1038 }
 0x3fb   : > { %v3041_v37 = vpop.permute.xlu0 %1044 }
 0x3fc   : > { %v1054_v34 = vsel %vm791_vm12, %v1041_v11, %v3041_v37 }
 0x3fd   : > { %v1069_v43 = vsel %vm760_vm9, %v1054_v34, -inf  ;;  %1306 = vrot.lane.b32.xlu1 %v3039_v3, %s1721_s26  ;;  %v1062_v2 = vsel %vm749_vm11, %v1054_v34, -inf }
 0x3fe   : > { %v1077_v28 = vmax.f32 %v1061_v45, %v1069_v43  ;;  %v1043_v41 = vpop.permute.xlu1 %1042  ;;  %v1581_v43 = vld [vmem:[%s2313_s6 + $0x8] sm:$0xff] }
 0x3ff   : > { %v1057_v60 = vsel %vm791_vm12, %v3037_v56, %v1043_v41 }
 0x400   : > { %v1085_v21 = vmax.f32 %v2856_v12, %v1077_v28  ;;  %v1065_v39 = vsel %vm748_vm13, %v1057_v60, -inf }
 0x401   : > { %1050 = vrot.lane.b32.xlu1 %v3056_v40, %s1721_s26 }
 0x402   : > { %v1101_v55 = vadd.f32 %v1085_v21, %v2305_v18  ;;  %v3065_v30 = vpop.permute.xlu1 %1046 }
 0x403   : > { %v1055_v15 = vsel %vm791_vm12, %v1043_v41, %v3065_v30 }
 0x404   : > { %1109 = vst [vmem:[%s2313_s6 + $0x88] sm:$0xff] %v1101_v55  ;;  %v1073_v12 = vsel %vm760_vm9, %v1055_v15, -inf  ;;  %v3101_v54 = vsel %vm749_vm11, %v1055_v15, -inf }
 0x405   : > { %v1081_v19 = vmax.f32 %v1065_v39, %v1073_v12 }
 0x407   : > { %v1089_v52 = vmax.f32 %v2897_v35, %v1081_v19 }
 0x409   : > { %v1105_v0 = vadd.f32 %v1089_v52, %v2338_v17 }
 0x40b   : > { %1113 = vst [vmem:[%s2313_s6 + $0xa8] sm:$0xff] %v1105_v0 }
 0x45c   : > { %v1293_v18 = vpop.permute.xlu0 %1292 }
 0x460   : > { %v1297_v31 = vpop.permute.xlu0 %1296 }
 0x461   : > { %v1312_v63 = vsel %vm791_vm12, %v1293_v18, %v1297_v31 }
 0x462   : > { %v1317_v32 = vsel %vm748_vm13, %v1312_v63, 0.0 }
 0x463   : > { %v3082_v16 = vpop.permute.xlu1 %1294  ;;  %v1325_v9 = vadd.f32 %v1317_v32, %v2958_v1  ;;  %v3097_v1 = vsel %vm759_vm14, %v1057_v60, -inf }
 0x464   : > { %v1301_v27 = vpop.permute.xlu0 %1300 }
 0x465   : > { %v1310_v8 = vsel %vm791_vm12, %v1297_v31, %v1301_v27  ;;  %v1118_v31 = vld [vmem:[%s2313_s6 + $0x10] sm:$0xff] }
 0x466   : > { %v1318_v17 = vsel %vm749_vm11, %v1310_v8, 0.0  ;;  %v1333_v35 = vsel %vm760_vm9, %v1310_v8, 0.0 }
 0x467   : > { %v1341_v6 = vadd.f32 %v1333_v35, %v1325_v9  ;;  %v1299_v46 = vpop.permute.xlu1 %1298  ;;  %v1326_v47 = vadd.f32 %v1318_v17, %v2982_v58  ;;  %v1332_v58 = vsel %vm759_vm14, %v1312_v63, 0.0 }
 0x468   : > { %v1305_v20 = vpop.permute.xlu0 %1304  ;;  %v1313_v42 = vsel %vm791_vm12, %v3082_v16, %v1299_v46 }
 0x469   : > { %v1349_v51 = vmul.f32 %v2441_v7, %v1341_v6  ;;  %v1308_v11 = vsel %vm791_vm12, %v1301_v27, %v1305_v20  ;;  %v1314_v36 = vsel %vm791_vm12, %v1305_v20, %v1293_v18  ;;  %v1321_v33 = vsel %vm748_vm13, %v1313_v42, 0.0  ;;  %v1119_v6 = vld [vmem:[%s2313_s6 + $0x18] sm:$0xff] }
 0x46a   : > { %v1316_v24 = vsel %vm3389_vm3, %v1314_v36, 0.0  ;;  %v1319_v34 = vsel %vm3390_vm4, %v1308_v11, 0.0  ;;  %v1334_v45 = vsel %vm3391_vm15, %v1308_v11, 0.0  ;;  %vm3392_vm13 = vcmp.le.f32.partialorder %v1987_v4, 6.5 }
 0x46b   : > { %v1357_v28 = vadd.f32 %v1581_v43, %v1349_v51  ;;  %v1324_v41 = vadd.f32 %v1316_v24, %v2941_v14  ;;  %v1327_v21 = vadd.f32 %v1319_v34, %v3004_v26  ;;  %v1342_v60 = vadd.f32 %v1334_v45, %v1326_v47  ;;  %v1303_v55 = vpop.permute.xlu1 %1302  ;;  %vm3396_vm10 = vmmov %vm3392_vm13 }
 0x46c   : > { %v1335_v15 = vsel %vm3392_vm13, %v1314_v36, 0.0  ;;  %v1329_v39 = vadd.f32 %v1321_v33, %v3000_v10  ;;  %v1336_v12 = vsel %vm759_vm14, %v1313_v42, 0.0  ;;  %v1049_v19 = vpop.permute.xlu0 %1048  ;;  %v1311_v52 = vsel %vm791_vm12, %v1299_v46, %v1303_v55  ;;  %vm3393_vm14 = vmmov %vm3390_vm4 }
 0x46d   : > { %1365 = vst [vmem:[%s2313_s6 + $0xc8] sm:$0xff] %v1357_v28  ;;  %v1340_v14 = vadd.f32 %v1332_v58, %v1324_v41  ;;  %v1343_v0 = vadd.f32 %v1335_v15, %v1327_v21  ;;  %v1350_v26 = vmul.f32 %v2457_v13, %v1342_v60  ;;  %v1052_v18 = vsel %vm791_vm12, %v3041_v37, %v1049_v19  ;;  %v1121_v21 = vld [vmem:[%s2313_s6 + $0x28] sm:$0xff]  ;;  %vm3400_vm2 = vmmov %vm3396_vm10 }
 0x46e   : > { %v1058_v10 = vsel %vm791_vm12, %v1049_v19, %v3002_v25  ;;  %v1063_v63 = vsel %vm3393_vm14, %v1052_v18, -inf  ;;  %v1070_v32 = vsel %vm3394_vm5, %v1052_v18, -inf  ;;  %v1322_v27 = vsel %vm749_vm11, %v1311_v52, 0.0  ;;  %v1116_v25 = vld [vmem:[%s2313_s6] sm:$0xff]  ;;  %vm3398_vm11 = vmmov %vm3394_vm5 }
 0x46f   : > { %v1348_v9 = vmul.f32 %v2465_v50, %v1340_v14  ;;  %v1351_v8 = vmul.f32 %v2472_v48, %v1343_v0  ;;  %v1358_v37 = vadd.f32 %v1350_v26, %v1118_v31  ;;  %v1060_v17 = vsel %vm3395_vm1, %v1058_v10, -inf  ;;  %v1307_v35 = vpop.permute.xlu1 %1306  ;;  %v1122_v0 = vld [vmem:[%s2313_s6 + $0x30] sm:$0xff] }
 0x470   : > { %v1071_v46 = vsel %vm3396_vm10, %v1058_v10, -inf  ;;  %v1076_v47 = vmax.f32 %v1060_v17, %v1068_v53  ;;  %v1078_v20 = vmax.f32 %v1062_v2, %v1070_v32  ;;  %v1330_v42 = vadd.f32 %v1322_v27, %v3019_v61 }
 0x471   : > { %v1356_v51 = vadd.f32 %v1348_v9, %v1116_v25  ;;  %v1359_v11 = vadd.f32 %v1351_v8, %v1119_v6  ;;  %1366 = vst [vmem:[%s2313_s6 + $0xd0] sm:$0xff] %v1358_v37  ;;  %v1079_v36 = vmax.f32 %v1063_v63, %v1071_v46  ;;  %v1337_v33 = vsel %vm760_vm9, %v1311_v52, 0.0  ;;  %vm3397_vm9 = vmmov %vm3390_vm4 }
 0x472   : > { %v1084_v58 = vmax.f32 %v2833_v5, %v1076_v47  ;;  %v1086_v24 = vmax.f32 %v2886_v23, %v1078_v20  ;;  %v1345_v34 = vadd.f32 %v1337_v33, %v1329_v39  ;;  %v1309_v45 = vsel %vm791_vm12, %v1303_v55, %v1307_v35 }
 0x473   : > { %1364 = vst [vmem:[%s2313_s6 + $0xc0] sm:$0xff] %v1356_v51  ;;  %1367 = vst [vmem:[%s2313_s6 + $0xd8] sm:$0xff] %v1359_v11  ;;  %v1087_v61 = vmax.f32 %v3025_v22, %v1079_v36  ;;  %v1315_v59 = vsel %vm791_vm12, %v1307_v35, %v3082_v16  ;;  %v1323_v5 = vsel %vm3397_vm9, %v1309_v45, 0.0  ;;  %v1338_v23 = vsel %vm3398_vm11, %v1309_v45, 0.0  ;;  %v1051_v53 = vpop.permute.xlu1 %1050 }
 0x474   : > { %v1100_v2 = vadd.f32 %v1116_v25, %v1084_v58  ;;  %v1102_v43 = vadd.f32 %v1118_v31, %v1086_v24  ;;  %v1353_v28 = vmul.f32 %v2441_v7, %v1345_v34  ;;  %v1320_v41 = vsel %vm3399_vm0, %v1315_v59, 0.0 }
 0x475   : > { %v1103_v22 = vadd.f32 %v1119_v6, %v1087_v61  ;;  %v1328_v16 = vadd.f32 %v1320_v41, %v2980_v38  ;;  %v1331_v60 = vadd.f32 %v1323_v5, %v3039_v3  ;;  %v1339_v55 = vsel %vm3400_vm2, %v1315_v59, 0.0 }
 0x476   : > { %1108 = vst [vmem:[%s2313_s6 + $0x80] sm:$0xff] %v1100_v2  ;;  %1110 = vst [vmem:[%s2313_s6 + $0x90] sm:$0xff] %v1102_v43  ;;  %v1361_v15 = vadd.f32 %v1353_v28, %v1121_v21  ;;  %v1346_v39 = vadd.f32 %v1338_v23, %v1330_v42  ;;  %v1053_v7 = vsel %vm791_vm12, %v3065_v30, %v1051_v53 }
 0x477   : > { %v1059_v19 = vsel %vm791_vm12, %v1051_v53, %v3037_v56  ;;  %1111 = vst [vmem:[%s2313_s6 + $0x98] sm:$0xff] %v1103_v22  ;;  %v1344_v38 = vadd.f32 %v1336_v12, %v1328_v16  ;;  %v1347_v3 = vadd.f32 %v1339_v55, %v1331_v60  ;;  %v1067_v14 = vsel %vm3402_vm7, %v1053_v7, -inf  ;;  %vm3404_vm12 = vmmov %vm3400_vm2 }
 0x478   : > { %v1064_v52 = vsel %vm3401_vm6, %v1059_v19, -inf  ;;  %1369 = vst [vmem:[%s2313_s6 + $0xe8] sm:$0xff] %v1361_v15  ;;  %v1354_v30 = vmul.f32 %v2457_v13, %v1346_v39  ;;  %v1074_v44 = vsel %vm3403_vm8, %v1053_v7, -inf  ;;  %v1075_v56 = vsel %vm3404_vm12, %v1059_v19, -inf  ;;  %v1123_v13 = vld [vmem:[%s2313_s6 + $0x38] sm:$0xff] }
 0x479   : > { %v1080_v12 = vmax.f32 %v1064_v52, %v3097_v1  ;;  %v1352_v57 = vmul.f32 %v2465_v50, %v1344_v38  ;;  %v1355_v26 = vmul.f32 %v2472_v48, %v1347_v3  ;;  %v1082_v18 = vmax.f32 %v3101_v54, %v1074_v44 }
 0x47a   : > { %v1083_v31 = vmax.f32 %v1067_v14, %v1075_v56  ;;  %v1362_v4 = vadd.f32 %v1354_v30, %v1122_v0 }
 0x47b   : > { %v1088_v1 = vmax.f32 %v2879_v49, %v1080_v12  ;;  %v1360_v10 = vadd.f32 %v1352_v57, %v1120_v62  ;;  %v1363_v50 = vadd.f32 %v1355_v26, %v1123_v13  ;;  %v1090_v48 = vmax.f32 %v2920_v29, %v1082_v18 }
 0x47c   : > { %v1091_v54 = vmax.f32 %v3056_v40, %v1083_v31  ;;  %1370 = vst [vmem:[%s2313_s6 + $0xf0] sm:$0xff] %v1362_v4 }
 0x47d   : > { %v1104_v63 = vadd.f32 %v1120_v62, %v1088_v1  ;;  %1368 = vst [vmem:[%s2313_s6 + $0xe0] sm:$0xff] %v1360_v10  ;;  %1371 = vst [vmem:[%s2313_s6 + $0xf8] sm:$0xff] %v1363_v50  ;;  %v1106_v49 = vadd.f32 %v1122_v0, %v1090_v48 }
 0x47e   : > { %v1107_v32 = vadd.f32 %v1123_v13, %v1091_v54 }
 0x47f   : > { %1112 = vst [vmem:[%s2313_s6 + $0xa0] sm:$0xff] %v1104_v63  ;;  %1114 = vst [vmem:[%s2313_s6 + $0xb0] sm:$0xff] %v1106_v49 }
 0x480   : > { %1115 = vst [vmem:[%s2313_s6 + $0xb8] sm:$0xff] %v1107_v32 }
 0x481   : > { %1655 = shalt.err (!%p1652_p1)
}
 0x482   : > { %s1656_s12 = scalar_lea.hbm %s3216_s14, 4096  ;;  %s1660_s23 = scalar_lea.hbm %s3271_s4, 8192 }
 0x483   : > { %p1657_p11 = scmp.ne.s32.totalorder %s3216_s14, %s1656_s12  ;;  %p1661_p4 = scmp.lt.u32.totalorder %s3216_s14, %s3271_s4 }
 0x484   : > { %p1662_p10 = scmp.lt.u32.totalorder %s1660_s23, %s1656_s12  ;;  %p1664_p6 = scmp.lt.u32.totalorder %s1656_s12, %s3216_s14 }
 0x485   : > { %p1658_p12 = pnand %p1657_p11, %p3405_p13 }
 0x486   : > { %p1663_p3 = por %p1662_p10, %p1661_p4 }
 0x487   : > { %p1659_p2 = pneg %p1658_p12 }
 0x488   : > { %p1665_p7 = por %p1664_p6, %p1663_p3 }
 0x48a   : > { %p1666_p5 = pnand %p1665_p7, %p1659_p2 }
 0x48c   : > { %1669 = shalt.err (!%p1666_p5)
}
 0x48d   : > { %s1724_s6 = smov 512   ;;  %s1725_s8 = smov 32  }
 0x48e   : > { %1513 = dma.vmem_to_hbm [thread:$0]  (%p3405_p13), %s3218_s30, 4096, %s3216_s14, %s1373_s29, %s1724_s6, %s1724_s6, %s1725_s8  }
 0x48f PF: > { %s1401_s19 = sand.u32 1, %s1700_s15   ;;  %p3406_p8 = scmp.ne.s32.totalorder %s3294_s28, 0 }
 0x490   : > { %p3407_p9 = scmp.ge.s32.totalorder %s1712_s18, 2  ;;  %s1402_s9 = scalar_lea.sflag [#allocation5], %s1401_s19 }
 0x492   : > { %p1523_p0 = pnand %p3407_p9, %p3406_p8 }
 0x494   : > { %1695 = dma.done.wait (!%p1523_p0), %s1402_s9, 4096  }
 0x495   : > { %1697 = vsyncadd (!%p1523_p0), %s1402_s9, 4294963200  ;;  %p20_p1 = scmp.ge.s32.totalorder %s1776_s21, 4   ;;  %s3408_s15 = smov %s1704_s16 }
 0x496   : > { %s3409_s16 = smov %s1708_s17  ;;  %s3410_s17 = smov %s1788_s24 }
 0x497   : > { %s3411_s18 = smov %s1776_s21  ;;  %22 = sbr.rel (!%p20_p1) target bundleno = 7 (0x7), region = 94 }
 0x49e   :  { %1407 = vsyncpa [#allocation4], 1 }
 0x49f   :  { %1409 = vsyncpa [#allocation4 + $0x1], 1 }
 0x4a0   :  { %1410 = vsyncpa [#allocation7], 1 }
 0x4a1   :  { %1412 = vsyncpa [#allocation7 + $0x1], 1 }
 0x4a2   :  { %1413 = vsyncpa [#allocation5], 1 }
 0x4a3   :  { %1415 = vsyncpa [#allocation5 + $0x1], 1 }

</bundles_post_ra>
